<compile_context>
chip_gen: v6e
topology: v6e:2x2x1
jax: 0.10.0
libtpu: 0.0.40
codegen_flags: <defaults>
</compile_context>

<pallas_src>
import jax
import jax.numpy as jnp
from jax import lax
from jax.experimental import pallas as pl
from jax.experimental.pallas import tpu as pltpu


def lstm_kernel(x_ref, w_ih_ref, b_ref, w_hh_ref, w_lin_ref, b_lin_ref,
                h0_ref, c0_ref,
                pred_ref, h_out_ref, c_out_ref,
                xp_ref):
    """Full recurrence + final linear projection, everything VMEM resident.

    x_ref:     (L, 1)        input sequence (batch=1 implicit, input_size=1)
    w_ih_ref:  (1, 4*Hp)     input->gate weights as a row, packed (i, f, o, g)
    b_ref:     (1, 4*Hp)     combined bias (b_ih + b_hh), same packing
    w_hh_ref:  (Hp, 4*Hp)    hidden->gate weights, bf16, same packing
    w_lin_ref: (O, Hp)       final linear weight (pre-transposed row(s))
    b_lin_ref: (O, 1)        final linear bias
    h0_ref/c0_ref: (1, Hp)   initial hidden / cell state (zero padded)
    pred_ref:  (O, 1)        prediction of the LAST time step
    h_out_ref/c_out_ref: (1, Hp)  final hidden / cell state (aliased to h0/c0)
    xp_ref:    (L, 4*Hp)     scratch: hoisted input projections
    """
    L = x_ref.shape[0]
    Hp = h0_ref.shape[1]

    # Hoisted input projection: input_size == 1 so x @ W_ih is an outer
    # product -> pure VPU broadcast multiply-add (no K=1 MXU weight load).
    xp_ref[...] = x_ref[...] * w_ih_ref[...] + b_ref[...]

    def step(t, carry):
        h, c = carry
        # Single fused (1, Hp) x (Hp, 4*Hp) MXU push per step; bf16 operands,
        # f32 accumulation (single-pass MXU, half the weight vld traffic).
        pre = (xp_ref[pl.ds(t, 1), :]
               + jnp.dot(h.astype(jnp.bfloat16), w_hh_ref[...],
                         preferred_element_type=jnp.float32))      # (1, 4*Hp)
        # Gate packing is (i, f, o, g).  Only i, f, g sit on the c_new
        # critical path; sigmoid(o) is issued afterwards so it can overlap
        # with tanh(c_new) instead of serializing the EUP.
        sig_if = jax.nn.sigmoid(pre[:, :2 * Hp])      # i, f in one bulk call
        i_g = sig_if[:, :Hp]
        f_g = sig_if[:, Hp:]
        g_g = jnp.tanh(pre[:, 3 * Hp:])               # g: one 128-lane slice
        c_new = f_g * c + i_g * g_g
        o_g = jax.nn.sigmoid(pre[:, 2 * Hp:3 * Hp])   # off the c_new chain
        h_new = o_g * jnp.tanh(c_new)
        return (h_new, c_new)

    # Fully unrolled: L is small and static; gives the scheduler cross-step
    # visibility so VPU/EUP work hides under MXU latency.
    h, c = lax.fori_loop(0, L, step, (h0_ref[...], c0_ref[...]), unroll=True)

    h_out_ref[...] = h
    c_out_ref[...] = c
    # Final Linear (N=1): VPU multiply + XLU cross-lane reduce instead of an
    # MXU weight push.
    pred_ref[...] = (jnp.sum(h * w_lin_ref[...], axis=1, keepdims=True)
                     + b_lin_ref[...])


def pack_params(params, hp):
    """One-time weight packing (layout plumbing, hoisted out of the per-call path).

    Gate packing order is (i, f, o, g).  NOTE: PyTorch's native weight_ih_l0
    stacking is (i, f, g, o); importing real nn.LSTM weights requires an
    explicit reorder.  Zero padding (h -> hp lanes) keeps padded h/c lanes
    exactly 0 through the recurrence.
    """
    w_ih, w_hh, b, w_lin, b_lin = params
    h = w_hh.shape[1]
    assert w_ih.shape[1] == 1, "kernel's VPU input projection assumes input_size == 1"
    order = (0, 1, 3, 2)                       # (i, f, g, o) -> (i, f, o, g)

    def pad_cols(m):                           # (r, h) -> (r, hp)
        return jnp.pad(m, ((0, 0), (0, hp - h)))

    w_ih_row = jnp.concatenate([pad_cols(w_ih[g]) for g in order], axis=1)
    b_row = jnp.concatenate([pad_cols(b[g]) for g in order], axis=1)
    w_hh_cat = jnp.concatenate(
        [jnp.pad(w_hh[g], ((0, hp - h), (0, hp - h))) for g in order],
        axis=1).astype(jnp.bfloat16)           # bf16 MXU operand (f32 accum)
    w_lin_row = pad_cols(w_lin.T)              # (O, hp)
    b_lin_col = b_lin.T                        # (O, 1)
    return (w_ih_row, b_row, w_hh_cat, w_lin_row, b_lin_col)


@jax.jit
def lstm_forward(x, packed, hidden_cell_padded):
    """Mirrors LSTM.forward: returns (predictions[-1], new PADDED hidden_cell).

    The hidden/cell state stays lane-padded (1, Hp) across calls so it can be
    fed straight back without per-call padding (preserving the zero-padding
    invariant); slice [:, :hidden] only when handing it back to the user.
    """
    w_ih_row, b_row, w_hh_cat, w_lin_row, b_lin_col = packed
    h0, c0 = hidden_cell_padded
    hp = h0.shape[1]
    o_size = w_lin_row.shape[0]
    seq_len = x.shape[0]

    vmem = pl.BlockSpec(memory_space=pltpu.MemorySpace.VMEM)

    pred, h_out, c_out = pl.pallas_call(
        lstm_kernel,
        out_shape=(
            jax.ShapeDtypeStruct((o_size, 1), jnp.float32),   # predictions[-1]
            jax.ShapeDtypeStruct((1, hp), jnp.float32),       # h_n (padded)
            jax.ShapeDtypeStruct((1, hp), jnp.float32),       # c_n (padded)
        ),
        in_specs=[vmem] * 8,
        out_specs=(vmem, vmem, vmem),
        scratch_shapes=[pltpu.VMEM((seq_len, w_ih_row.shape[1]), jnp.float32)],
        input_output_aliases={6: 1, 7: 2},     # h0 -> h_out, c0 -> c_out
        # Everything is VMEM resident; ~200 KiB actual, 8 MiB documents headroom.
        compiler_params=pltpu.CompilerParams(vmem_limit_bytes=8 * 1024 * 1024),
    )(x, w_ih_row, b_row, w_hh_cat, w_lin_row, b_lin_col, h0, c0)

    # predictions[-1] in PyTorch has shape (output_size,)
    return pred.reshape(o_size), (h_out, c_out)


def lstm_reference(x, params, hidden_cell):
    """Pure-JAX reference of the same forward pass (correctness check)."""
    w_ih, w_hh, b, w_lin, b_lin = params
    h, c = hidden_cell
    L = x.shape[0]
    for t in range(L):
        x_t = x[t:t + 1, :]
        gates = [x_t @ w_ih[g] + h @ w_hh[g] + b[g] for g in range(4)]
        i_g = jax.nn.sigmoid(gates[0])
        f_g = jax.nn.sigmoid(gates[1])
        g_g = jnp.tanh(gates[2])
        o_g = jax.nn.sigmoid(gates[3])
        c = f_g * c + i_g * g_g
        h = o_g * jnp.tanh(c)
    pred = h @ w_lin + b_lin
    return pred.reshape(-1), (h, c)


def init_params(key, input_size, hidden, output_size):
    """Deterministic uniform(-1/sqrt(H), 1/sqrt(H)) init (like PyTorch's LSTM)."""
    ks = jax.random.split(key, 6)
    s = 1.0 / jnp.sqrt(hidden)
    w_ih = jax.random.uniform(ks[0], (4, input_size, hidden), jnp.float32, -s, s)
    w_hh = jax.random.uniform(ks[1], (4, hidden, hidden), jnp.float32, -s, s)
    # combined bias = b_ih + b_hh
    b = (jax.random.uniform(ks[2], (4, 1, hidden), jnp.float32, -s, s)
         + jax.random.uniform(ks[3], (4, 1, hidden), jnp.float32, -s, s))
    w_lin = jax.random.uniform(ks[4], (hidden, output_size), jnp.float32, -s, s)
    b_lin = jax.random.uniform(ks[5], (1, output_size), jnp.float32, -s, s)
    return (w_ih, w_hh, b, w_lin, b_lin)


if __name__ == "__main__":
    INPUT_SIZE = 1
    HIDDEN = 100
    OUTPUT_SIZE = 1
    SEQ_LEN = 8

    key = jax.random.PRNGKey(0)
    k_param, k_x = jax.random.split(key)

    params = init_params(k_param, INPUT_SIZE, HIDDEN, OUTPUT_SIZE)
    x = jax.random.normal(k_x, (SEQ_LEN, INPUT_SIZE), jnp.float32)

    HP = ((HIDDEN + 127) // 128) * 128         # lane-dense padded hidden size

    # One-time packing, hoisted out of the per-call path.
    packed = pack_params(params, HP)

    # self.hidden_cell starts at zeros; kept zero-PADDED across calls so the
    # padded-lane invariant holds and no per-call padding is needed.
    hidden_cell_p = (jnp.zeros((1, HP), jnp.float32),
                     jnp.zeros((1, HP), jnp.float32))

    pred, new_hidden_cell_p = lstm_forward(x, packed, hidden_cell_p)
    pred = jax.block_until_ready(pred)

    ref_hidden_cell = (jnp.zeros((1, HIDDEN), jnp.float32),
                       jnp.zeros((1, HIDDEN), jnp.float32))
    ref_pred, (ref_h, ref_c) = lstm_reference(x, params, ref_hidden_cell)

    assert pred.shape == (OUTPUT_SIZE,)
    # Recurrent matmul runs bf16 operands with f32 accumulation -> slightly
    # looser tolerance than pure f32.
    assert jnp.allclose(pred, ref_pred, rtol=2e-3, atol=2e-3)
    assert jnp.allclose(new_hidden_cell_p[0][:, :HIDDEN], ref_h, rtol=2e-3, atol=2e-3)
    assert jnp.allclose(new_hidden_cell_p[1][:, :HIDDEN], ref_c, rtol=2e-3, atol=2e-3)

    print("KERNEL_OK")
</pallas_src>

<mosaic_0001>
module attributes {stable_mosaic.version = 11 : i64} {
  func.func @lstm_kernel(%arg0: memref<8x1xf32, #tpu.memory_space<vmem>>, %arg1: memref<1x512xf32, #tpu.memory_space<vmem>>, %arg2: memref<1x512xf32, #tpu.memory_space<vmem>>, %arg3: memref<128x512xbf16, #tpu.memory_space<vmem>>, %arg4: memref<1x128xf32, #tpu.memory_space<vmem>>, %arg5: memref<1x1xf32, #tpu.memory_space<vmem>>, %arg6: memref<1x128xf32, #tpu.memory_space<vmem>>, %arg7: memref<1x128xf32, #tpu.memory_space<vmem>>, %arg8: memref<1x1xf32, #tpu.memory_space<vmem>>, %arg9: memref<1x128xf32, #tpu.memory_space<vmem>>, %arg10: memref<1x128xf32, #tpu.memory_space<vmem>>, %arg11: memref<8x512xf32, #tpu.memory_space<vmem>>) attributes {dimension_semantics = [], scalar_prefetch = 0 : i64, scratch_operands = 1 : i64, tpu.core_type = #tpu.core_type<tc>} {
    %c0 = arith.constant 0 : index
    %c0_0 = arith.constant 0 : index
    %0 = vector.load %arg0[%c0, %c0_0] : memref<8x1xf32, #tpu.memory_space<vmem>>, vector<8x1xf32>
    %c0_1 = arith.constant 0 : index
    %c0_2 = arith.constant 0 : index
    %1 = vector.load %arg1[%c0_1, %c0_2] : memref<1x512xf32, #tpu.memory_space<vmem>>, vector<1x512xf32>
    %2 = vector.broadcast %0 : vector<8x1xf32> to vector<8x512xf32>
    %3 = vector.broadcast %1 : vector<1x512xf32> to vector<8x512xf32>
    %4 = arith.mulf %2, %3 : vector<8x512xf32>
    %c0_3 = arith.constant 0 : index
    %c0_4 = arith.constant 0 : index
    %5 = vector.load %arg2[%c0_3, %c0_4] : memref<1x512xf32, #tpu.memory_space<vmem>>, vector<1x512xf32>
    %6 = vector.broadcast %5 : vector<1x512xf32> to vector<8x512xf32>
    %7 = arith.addf %4, %6 : vector<8x512xf32>
    %c0_5 = arith.constant 0 : index
    %c0_6 = arith.constant 0 : index
    %8 = vector.load %arg11[%c0_5, %c0_6] : memref<8x512xf32, #tpu.memory_space<vmem>>, vector<8x512xf32>
    tpu.vector_store %arg11[%c0_5, %c0_6], %7 {strides = array<i32>} : memref<8x512xf32, #tpu.memory_space<vmem>>, vector<8x512xf32>,
    %c0_7 = arith.constant 0 : index
    %c0_8 = arith.constant 0 : index
    %9 = vector.load %arg6[%c0_7, %c0_8] : memref<1x128xf32, #tpu.memory_space<vmem>>, vector<1x128xf32>
    %c0_9 = arith.constant 0 : index
    %c0_10 = arith.constant 0 : index
    %10 = vector.load %arg7[%c0_9, %c0_10] : memref<1x128xf32, #tpu.memory_space<vmem>>, vector<1x128xf32>
    %c0_i32 = arith.constant 0 : i32
    %11 = arith.index_cast %c0_i32 : i32 to index
    %c0_11 = arith.constant 0 : index
    %12 = vector.load %arg11[%11, %c0_11] : memref<8x512xf32, #tpu.memory_space<vmem>>, vector<1x512xf32>
    %13 = arith.truncf %9 : vector<1x128xf32> to vector<1x128xbf16>
    %c0_12 = arith.constant 0 : index
    %c0_13 = arith.constant 0 : index
    %14 = vector.load %arg3[%c0_12, %c0_13] : memref<128x512xbf16, #tpu.memory_space<vmem>>, vector<128x512xbf16>
    %cst = arith.constant dense<0.000000e+00> : vector<1x512xf32>
    %15 = tpu.matmul %13, %14, %cst {dimension_numbers = #tpu.dot_dimension_numbers<[1], [0], [0], [1], [0, 0, 1, 1], [], []>} : vector<1x128xbf16>, vector<128x512xbf16>, vector<1x512xf32> -> vector<1x512xf32>
    %16 = arith.addf %12, %15 : vector<1x512xf32>
    %17 = vector.extract_strided_slice %16 {offsets = [0, 0], sizes = [1, 256], strides = [1, 1]} : vector<1x512xf32> to vector<1x256xf32>
    %18 = arith.negf %17 : vector<1x256xf32>
    %19 = math.exp %18 : vector<1x256xf32>
    %cst_14 = arith.constant 1.000000e+00 : f32
    %20 = vector.broadcast %cst_14 : f32 to vector<1x256xf32>
    %21 = arith.addf %20, %19 : vector<1x256xf32>
    %22 = arith.divf %20, %21 : vector<1x256xf32>
    %23 = vector.extract_strided_slice %22 {offsets = [0, 0], sizes = [1, 128], strides = [1, 1]} : vector<1x256xf32> to vector<1x128xf32>
    %24 = vector.extract_strided_slice %22 {offsets = [0, 128], sizes = [1, 128], strides = [1, 1]} : vector<1x256xf32> to vector<1x128xf32>
    %25 = vector.extract_strided_slice %16 {offsets = [0, 384], sizes = [1, 128], strides = [1, 1]} : vector<1x512xf32> to vector<1x128xf32>
    %26 = math.tanh %25 : vector<1x128xf32>
    %27 = arith.mulf %24, %10 : vector<1x128xf32>
    %28 = arith.mulf %23, %26 : vector<1x128xf32>
    %29 = arith.addf %27, %28 : vector<1x128xf32>
    %30 = vector.extract_strided_slice %16 {offsets = [0, 256], sizes = [1, 128], strides = [1, 1]} : vector<1x512xf32> to vector<1x128xf32>
    %31 = arith.negf %30 : vector<1x128xf32>
    %32 = math.exp %31 : vector<1x128xf32>
    %cst_15 = arith.constant 1.000000e+00 : f32
    %33 = vector.broadcast %cst_15 : f32 to vector<1x128xf32>
    %34 = arith.addf %33, %32 : vector<1x128xf32>
    %35 = arith.divf %33, %34 : vector<1x128xf32>
    %36 = math.tanh %29 : vector<1x128xf32>
    %37 = arith.mulf %35, %36 : vector<1x128xf32>
    %c1_i32 = arith.constant 1 : i32
    %38 = arith.index_cast %c1_i32 : i32 to index
    %c0_16 = arith.constant 0 : index
    %39 = vector.load %arg11[%38, %c0_16] : memref<8x512xf32, #tpu.memory_space<vmem>>, vector<1x512xf32>
    %40 = arith.truncf %37 : vector<1x128xf32> to vector<1x128xbf16>
    %c0_17 = arith.constant 0 : index
    %c0_18 = arith.constant 0 : index
    %41 = vector.load %arg3[%c0_17, %c0_18] : memref<128x512xbf16, #tpu.memory_space<vmem>>, vector<128x512xbf16>
    %cst_19 = arith.constant dense<0.000000e+00> : vector<1x512xf32>
    %42 = tpu.matmul %40, %41, %cst_19 {dimension_numbers = #tpu.dot_dimension_numbers<[1], [0], [0], [1], [0, 0, 1, 1], [], []>} : vector<1x128xbf16>, vector<128x512xbf16>, vector<1x512xf32> -> vector<1x512xf32>
    %43 = arith.addf %39, %42 : vector<1x512xf32>
    %44 = vector.extract_strided_slice %43 {offsets = [0, 0], sizes = [1, 256], strides = [1, 1]} : vector<1x512xf32> to vector<1x256xf32>
    %45 = arith.negf %44 : vector<1x256xf32>
    %46 = math.exp %45 : vector<1x256xf32>
    %cst_20 = arith.constant 1.000000e+00 : f32
    %47 = vector.broadcast %cst_20 : f32 to vector<1x256xf32>
    %48 = arith.addf %47, %46 : vector<1x256xf32>
    %49 = arith.divf %47, %48 : vector<1x256xf32>
    %50 = vector.extract_strided_slice %49 {offsets = [0, 0], sizes = [1, 128], strides = [1, 1]} : vector<1x256xf32> to vector<1x128xf32>
    %51 = vector.extract_strided_slice %49 {offsets = [0, 128], sizes = [1, 128], strides = [1, 1]} : vector<1x256xf32> to vector<1x128xf32>
    %52 = vector.extract_strided_slice %43 {offsets = [0, 384], sizes = [1, 128], strides = [1, 1]} : vector<1x512xf32> to vector<1x128xf32>
    %53 = math.tanh %52 : vector<1x128xf32>
    %54 = arith.mulf %51, %29 : vector<1x128xf32>
    %55 = arith.mulf %50, %53 : vector<1x128xf32>
    %56 = arith.addf %54, %55 : vector<1x128xf32>
    %57 = vector.extract_strided_slice %43 {offsets = [0, 256], sizes = [1, 128], strides = [1, 1]} : vector<1x512xf32> to vector<1x128xf32>
    %58 = arith.negf %57 : vector<1x128xf32>
    %59 = math.exp %58 : vector<1x128xf32>
    %cst_21 = arith.constant 1.000000e+00 : f32
    %60 = vector.broadcast %cst_21 : f32 to vector<1x128xf32>
    %61 = arith.addf %60, %59 : vector<1x128xf32>
    %62 = arith.divf %60, %61 : vector<1x128xf32>
    %63 = math.tanh %56 : vector<1x128xf32>
    %64 = arith.mulf %62, %63 : vector<1x128xf32>
    %c2_i32 = arith.constant 2 : i32
    %65 = arith.index_cast %c2_i32 : i32 to index
    %c0_22 = arith.constant 0 : index
    %66 = vector.load %arg11[%65, %c0_22] : memref<8x512xf32, #tpu.memory_space<vmem>>, vector<1x512xf32>
    %67 = arith.truncf %64 : vector<1x128xf32> to vector<1x128xbf16>
    %c0_23 = arith.constant 0 : index
    %c0_24 = arith.constant 0 : index
    %68 = vector.load %arg3[%c0_23, %c0_24] : memref<128x512xbf16, #tpu.memory_space<vmem>>, vector<128x512xbf16>
    %cst_25 = arith.constant dense<0.000000e+00> : vector<1x512xf32>
    %69 = tpu.matmul %67, %68, %cst_25 {dimension_numbers = #tpu.dot_dimension_numbers<[1], [0], [0], [1], [0, 0, 1, 1], [], []>} : vector<1x128xbf16>, vector<128x512xbf16>, vector<1x512xf32> -> vector<1x512xf32>
    %70 = arith.addf %66, %69 : vector<1x512xf32>
    %71 = vector.extract_strided_slice %70 {offsets = [0, 0], sizes = [1, 256], strides = [1, 1]} : vector<1x512xf32> to vector<1x256xf32>
    %72 = arith.negf %71 : vector<1x256xf32>
    %73 = math.exp %72 : vector<1x256xf32>
    %cst_26 = arith.constant 1.000000e+00 : f32
    %74 = vector.broadcast %cst_26 : f32 to vector<1x256xf32>
    %75 = arith.addf %74, %73 : vector<1x256xf32>
    %76 = arith.divf %74, %75 : vector<1x256xf32>
    %77 = vector.extract_strided_slice %76 {offsets = [0, 0], sizes = [1, 128], strides = [1, 1]} : vector<1x256xf32> to vector<1x128xf32>
    %78 = vector.extract_strided_slice %76 {offsets = [0, 128], sizes = [1, 128], strides = [1, 1]} : vector<1x256xf32> to vector<1x128xf32>
    %79 = vector.extract_strided_slice %70 {offsets = [0, 384], sizes = [1, 128], strides = [1, 1]} : vector<1x512xf32> to vector<1x128xf32>
    %80 = math.tanh %79 : vector<1x128xf32>
    %81 = arith.mulf %78, %56 : vector<1x128xf32>
    %82 = arith.mulf %77, %80 : vector<1x128xf32>
    %83 = arith.addf %81, %82 : vector<1x128xf32>
    %84 = vector.extract_strided_slice %70 {offsets = [0, 256], sizes = [1, 128], strides = [1, 1]} : vector<1x512xf32> to vector<1x128xf32>
    %85 = arith.negf %84 : vector<1x128xf32>
    %86 = math.exp %85 : vector<1x128xf32>
    %cst_27 = arith.constant 1.000000e+00 : f32
    %87 = vector.broadcast %cst_27 : f32 to vector<1x128xf32>
    %88 = arith.addf %87, %86 : vector<1x128xf32>
    %89 = arith.divf %87, %88 : vector<1x128xf32>
    %90 = math.tanh %83 : vector<1x128xf32>
    %91 = arith.mulf %89, %90 : vector<1x128xf32>
    %c3_i32 = arith.constant 3 : i32
    %92 = arith.index_cast %c3_i32 : i32 to index
    %c0_28 = arith.constant 0 : index
    %93 = vector.load %arg11[%92, %c0_28] : memref<8x512xf32, #tpu.memory_space<vmem>>, vector<1x512xf32>
    %94 = arith.truncf %91 : vector<1x128xf32> to vector<1x128xbf16>
    %c0_29 = arith.constant 0 : index
    %c0_30 = arith.constant 0 : index
    %95 = vector.load %arg3[%c0_29, %c0_30] : memref<128x512xbf16, #tpu.memory_space<vmem>>, vector<128x512xbf16>
    %cst_31 = arith.constant dense<0.000000e+00> : vector<1x512xf32>
    %96 = tpu.matmul %94, %95, %cst_31 {dimension_numbers = #tpu.dot_dimension_numbers<[1], [0], [0], [1], [0, 0, 1, 1], [], []>} : vector<1x128xbf16>, vector<128x512xbf16>, vector<1x512xf32> -> vector<1x512xf32>
    %97 = arith.addf %93, %96 : vector<1x512xf32>
    %98 = vector.extract_strided_slice %97 {offsets = [0, 0], sizes = [1, 256], strides = [1, 1]} : vector<1x512xf32> to vector<1x256xf32>
    %99 = arith.negf %98 : vector<1x256xf32>
    %100 = math.exp %99 : vector<1x256xf32>
    %cst_32 = arith.constant 1.000000e+00 : f32
    %101 = vector.broadcast %cst_32 : f32 to vector<1x256xf32>
    %102 = arith.addf %101, %100 : vector<1x256xf32>
    %103 = arith.divf %101, %102 : vector<1x256xf32>
    %104 = vector.extract_strided_slice %103 {offsets = [0, 0], sizes = [1, 128], strides = [1, 1]} : vector<1x256xf32> to vector<1x128xf32>
    %105 = vector.extract_strided_slice %103 {offsets = [0, 128], sizes = [1, 128], strides = [1, 1]} : vector<1x256xf32> to vector<1x128xf32>
    %106 = vector.extract_strided_slice %97 {offsets = [0, 384], sizes = [1, 128], strides = [1, 1]} : vector<1x512xf32> to vector<1x128xf32>
    %107 = math.tanh %106 : vector<1x128xf32>
    %108 = arith.mulf %105, %83 : vector<1x128xf32>
    %109 = arith.mulf %104, %107 : vector<1x128xf32>
    %110 = arith.addf %108, %109 : vector<1x128xf32>
    %111 = vector.extract_strided_slice %97 {offsets = [0, 256], sizes = [1, 128], strides = [1, 1]} : vector<1x512xf32> to vector<1x128xf32>
    %112 = arith.negf %111 : vector<1x128xf32>
    %113 = math.exp %112 : vector<1x128xf32>
    %cst_33 = arith.constant 1.000000e+00 : f32
    %114 = vector.broadcast %cst_33 : f32 to vector<1x128xf32>
    %115 = arith.addf %114, %113 : vector<1x128xf32>
    %116 = arith.divf %114, %115 : vector<1x128xf32>
    %117 = math.tanh %110 : vector<1x128xf32>
    %118 = arith.mulf %116, %117 : vector<1x128xf32>
    %c4_i32 = arith.constant 4 : i32
    %119 = arith.index_cast %c4_i32 : i32 to index
    %c0_34 = arith.constant 0 : index
    %120 = vector.load %arg11[%119, %c0_34] : memref<8x512xf32, #tpu.memory_space<vmem>>, vector<1x512xf32>
    %121 = arith.truncf %118 : vector<1x128xf32> to vector<1x128xbf16>
    %c0_35 = arith.constant 0 : index
    %c0_36 = arith.constant 0 : index
    %122 = vector.load %arg3[%c0_35, %c0_36] : memref<128x512xbf16, #tpu.memory_space<vmem>>, vector<128x512xbf16>
    %cst_37 = arith.constant dense<0.000000e+00> : vector<1x512xf32>
    %123 = tpu.matmul %121, %122, %cst_37 {dimension_numbers = #tpu.dot_dimension_numbers<[1], [0], [0], [1], [0, 0, 1, 1], [], []>} : vector<1x128xbf16>, vector<128x512xbf16>, vector<1x512xf32> -> vector<1x512xf32>
    %124 = arith.addf %120, %123 : vector<1x512xf32>
    %125 = vector.extract_strided_slice %124 {offsets = [0, 0], sizes = [1, 256], strides = [1, 1]} : vector<1x512xf32> to vector<1x256xf32>
    %126 = arith.negf %125 : vector<1x256xf32>
    %127 = math.exp %126 : vector<1x256xf32>
    %cst_38 = arith.constant 1.000000e+00 : f32
    %128 = vector.broadcast %cst_38 : f32 to vector<1x256xf32>
    %129 = arith.addf %128, %127 : vector<1x256xf32>
    %130 = arith.divf %128, %129 : vector<1x256xf32>
    %131 = vector.extract_strided_slice %130 {offsets = [0, 0], sizes = [1, 128], strides = [1, 1]} : vector<1x256xf32> to vector<1x128xf32>
    %132 = vector.extract_strided_slice %130 {offsets = [0, 128], sizes = [1, 128], strides = [1, 1]} : vector<1x256xf32> to vector<1x128xf32>
    %133 = vector.extract_strided_slice %124 {offsets = [0, 384], sizes = [1, 128], strides = [1, 1]} : vector<1x512xf32> to vector<1x128xf32>
    %134 = math.tanh %133 : vector<1x128xf32>
    %135 = arith.mulf %132, %110 : vector<1x128xf32>
    %136 = arith.mulf %131, %134 : vector<1x128xf32>
    %137 = arith.addf %135, %136 : vector<1x128xf32>
    %138 = vector.extract_strided_slice %124 {offsets = [0, 256], sizes = [1, 128], strides = [1, 1]} : vector<1x512xf32> to vector<1x128xf32>
    %139 = arith.negf %138 : vector<1x128xf32>
    %140 = math.exp %139 : vector<1x128xf32>
    %cst_39 = arith.constant 1.000000e+00 : f32
    %141 = vector.broadcast %cst_39 : f32 to vector<1x128xf32>
    %142 = arith.addf %141, %140 : vector<1x128xf32>
    %143 = arith.divf %141, %142 : vector<1x128xf32>
    %144 = math.tanh %137 : vector<1x128xf32>
    %145 = arith.mulf %143, %144 : vector<1x128xf32>
    %c5_i32 = arith.constant 5 : i32
    %146 = arith.index_cast %c5_i32 : i32 to index
    %c0_40 = arith.constant 0 : index
    %147 = vector.load %arg11[%146, %c0_40] : memref<8x512xf32, #tpu.memory_space<vmem>>, vector<1x512xf32>
    %148 = arith.truncf %145 : vector<1x128xf32> to vector<1x128xbf16>
    %c0_41 = arith.constant 0 : index
    %c0_42 = arith.constant 0 : index
    %149 = vector.load %arg3[%c0_41, %c0_42] : memref<128x512xbf16, #tpu.memory_space<vmem>>, vector<128x512xbf16>
    %cst_43 = arith.constant dense<0.000000e+00> : vector<1x512xf32>
    %150 = tpu.matmul %148, %149, %cst_43 {dimension_numbers = #tpu.dot_dimension_numbers<[1], [0], [0], [1], [0, 0, 1, 1], [], []>} : vector<1x128xbf16>, vector<128x512xbf16>, vector<1x512xf32> -> vector<1x512xf32>
    %151 = arith.addf %147, %150 : vector<1x512xf32>
    %152 = vector.extract_strided_slice %151 {offsets = [0, 0], sizes = [1, 256], strides = [1, 1]} : vector<1x512xf32> to vector<1x256xf32>
    %153 = arith.negf %152 : vector<1x256xf32>
    %154 = math.exp %153 : vector<1x256xf32>
    %cst_44 = arith.constant 1.000000e+00 : f32
    %155 = vector.broadcast %cst_44 : f32 to vector<1x256xf32>
    %156 = arith.addf %155, %154 : vector<1x256xf32>
    %157 = arith.divf %155, %156 : vector<1x256xf32>
    %158 = vector.extract_strided_slice %157 {offsets = [0, 0], sizes = [1, 128], strides = [1, 1]} : vector<1x256xf32> to vector<1x128xf32>
    %159 = vector.extract_strided_slice %157 {offsets = [0, 128], sizes = [1, 128], strides = [1, 1]} : vector<1x256xf32> to vector<1x128xf32>
    %160 = vector.extract_strided_slice %151 {offsets = [0, 384], sizes = [1, 128], strides = [1, 1]} : vector<1x512xf32> to vector<1x128xf32>
    %161 = math.tanh %160 : vector<1x128xf32>
    %162 = arith.mulf %159, %137 : vector<1x128xf32>
    %163 = arith.mulf %158, %161 : vector<1x128xf32>
    %164 = arith.addf %162, %163 : vector<1x128xf32>
    %165 = vector.extract_strided_slice %151 {offsets = [0, 256], sizes = [1, 128], strides = [1, 1]} : vector<1x512xf32> to vector<1x128xf32>
    %166 = arith.negf %165 : vector<1x128xf32>
    %167 = math.exp %166 : vector<1x128xf32>
    %cst_45 = arith.constant 1.000000e+00 : f32
    %168 = vector.broadcast %cst_45 : f32 to vector<1x128xf32>
    %169 = arith.addf %168, %167 : vector<1x128xf32>
    %170 = arith.divf %168, %169 : vector<1x128xf32>
    %171 = math.tanh %164 : vector<1x128xf32>
    %172 = arith.mulf %170, %171 : vector<1x128xf32>
    %c6_i32 = arith.constant 6 : i32
    %173 = arith.index_cast %c6_i32 : i32 to index
    %c0_46 = arith.constant 0 : index
    %174 = vector.load %arg11[%173, %c0_46] : memref<8x512xf32, #tpu.memory_space<vmem>>, vector<1x512xf32>
    %175 = arith.truncf %172 : vector<1x128xf32> to vector<1x128xbf16>
    %c0_47 = arith.constant 0 : index
    %c0_48 = arith.constant 0 : index
    %176 = vector.load %arg3[%c0_47, %c0_48] : memref<128x512xbf16, #tpu.memory_space<vmem>>, vector<128x512xbf16>
    %cst_49 = arith.constant dense<0.000000e+00> : vector<1x512xf32>
    %177 = tpu.matmul %175, %176, %cst_49 {dimension_numbers = #tpu.dot_dimension_numbers<[1], [0], [0], [1], [0, 0, 1, 1], [], []>} : vector<1x128xbf16>, vector<128x512xbf16>, vector<1x512xf32> -> vector<1x512xf32>
    %178 = arith.addf %174, %177 : vector<1x512xf32>
    %179 = vector.extract_strided_slice %178 {offsets = [0, 0], sizes = [1, 256], strides = [1, 1]} : vector<1x512xf32> to vector<1x256xf32>
    %180 = arith.negf %179 : vector<1x256xf32>
    %181 = math.exp %180 : vector<1x256xf32>
    %cst_50 = arith.constant 1.000000e+00 : f32
    %182 = vector.broadcast %cst_50 : f32 to vector<1x256xf32>
    %183 = arith.addf %182, %181 : vector<1x256xf32>
    %184 = arith.divf %182, %183 : vector<1x256xf32>
    %185 = vector.extract_strided_slice %184 {offsets = [0, 0], sizes = [1, 128], strides = [1, 1]} : vector<1x256xf32> to vector<1x128xf32>
    %186 = vector.extract_strided_slice %184 {offsets = [0, 128], sizes = [1, 128], strides = [1, 1]} : vector<1x256xf32> to vector<1x128xf32>
    %187 = vector.extract_strided_slice %178 {offsets = [0, 384], sizes = [1, 128], strides = [1, 1]} : vector<1x512xf32> to vector<1x128xf32>
    %188 = math.tanh %187 : vector<1x128xf32>
    %189 = arith.mulf %186, %164 : vector<1x128xf32>
    %190 = arith.mulf %185, %188 : vector<1x128xf32>
    %191 = arith.addf %189, %190 : vector<1x128xf32>
    %192 = vector.extract_strided_slice %178 {offsets = [0, 256], sizes = [1, 128], strides = [1, 1]} : vector<1x512xf32> to vector<1x128xf32>
    %193 = arith.negf %192 : vector<1x128xf32>
    %194 = math.exp %193 : vector<1x128xf32>
    %cst_51 = arith.constant 1.000000e+00 : f32
    %195 = vector.broadcast %cst_51 : f32 to vector<1x128xf32>
    %196 = arith.addf %195, %194 : vector<1x128xf32>
    %197 = arith.divf %195, %196 : vector<1x128xf32>
    %198 = math.tanh %191 : vector<1x128xf32>
    %199 = arith.mulf %197, %198 : vector<1x128xf32>
    %c7_i32 = arith.constant 7 : i32
    %200 = arith.index_cast %c7_i32 : i32 to index
    %c0_52 = arith.constant 0 : index
    %201 = vector.load %arg11[%200, %c0_52] : memref<8x512xf32, #tpu.memory_space<vmem>>, vector<1x512xf32>
    %202 = arith.truncf %199 : vector<1x128xf32> to vector<1x128xbf16>
    %c0_53 = arith.constant 0 : index
    %c0_54 = arith.constant 0 : index
    %203 = vector.load %arg3[%c0_53, %c0_54] : memref<128x512xbf16, #tpu.memory_space<vmem>>, vector<128x512xbf16>
    %cst_55 = arith.constant dense<0.000000e+00> : vector<1x512xf32>
    %204 = tpu.matmul %202, %203, %cst_55 {dimension_numbers = #tpu.dot_dimension_numbers<[1], [0], [0], [1], [0, 0, 1, 1], [], []>} : vector<1x128xbf16>, vector<128x512xbf16>, vector<1x512xf32> -> vector<1x512xf32>
    %205 = arith.addf %201, %204 : vector<1x512xf32>
    %206 = vector.extract_strided_slice %205 {offsets = [0, 0], sizes = [1, 256], strides = [1, 1]} : vector<1x512xf32> to vector<1x256xf32>
    %207 = arith.negf %206 : vector<1x256xf32>
    %208 = math.exp %207 : vector<1x256xf32>
    %cst_56 = arith.constant 1.000000e+00 : f32
    %209 = vector.broadcast %cst_56 : f32 to vector<1x256xf32>
    %210 = arith.addf %209, %208 : vector<1x256xf32>
    %211 = arith.divf %209, %210 : vector<1x256xf32>
    %212 = vector.extract_strided_slice %211 {offsets = [0, 0], sizes = [1, 128], strides = [1, 1]} : vector<1x256xf32> to vector<1x128xf32>
    %213 = vector.extract_strided_slice %211 {offsets = [0, 128], sizes = [1, 128], strides = [1, 1]} : vector<1x256xf32> to vector<1x128xf32>
    %214 = vector.extract_strided_slice %205 {offsets = [0, 384], sizes = [1, 128], strides = [1, 1]} : vector<1x512xf32> to vector<1x128xf32>
    %215 = math.tanh %214 : vector<1x128xf32>
    %216 = arith.mulf %213, %191 : vector<1x128xf32>
    %217 = arith.mulf %212, %215 : vector<1x128xf32>
    %218 = arith.addf %216, %217 : vector<1x128xf32>
    %219 = vector.extract_strided_slice %205 {offsets = [0, 256], sizes = [1, 128], strides = [1, 1]} : vector<1x512xf32> to vector<1x128xf32>
    %220 = arith.negf %219 : vector<1x128xf32>
    %221 = math.exp %220 : vector<1x128xf32>
    %cst_57 = arith.constant 1.000000e+00 : f32
    %222 = vector.broadcast %cst_57 : f32 to vector<1x128xf32>
    %223 = arith.addf %222, %221 : vector<1x128xf32>
    %224 = arith.divf %222, %223 : vector<1x128xf32>
    %225 = math.tanh %218 : vector<1x128xf32>
    %226 = arith.mulf %224, %225 : vector<1x128xf32>
    %c8_i32 = arith.constant 8 : i32
    %c0_58 = arith.constant 0 : index
    %c0_59 = arith.constant 0 : index
    %227 = vector.load %arg9[%c0_58, %c0_59] : memref<1x128xf32, #tpu.memory_space<vmem>>, vector<1x128xf32>
    tpu.vector_store %arg9[%c0_58, %c0_59], %226 {strides = array<i32>} : memref<1x128xf32, #tpu.memory_space<vmem>>, vector<1x128xf32>,
    %c0_60 = arith.constant 0 : index
    %c0_61 = arith.constant 0 : index
    %228 = vector.load %arg10[%c0_60, %c0_61] : memref<1x128xf32, #tpu.memory_space<vmem>>, vector<1x128xf32>
    tpu.vector_store %arg10[%c0_60, %c0_61], %218 {strides = array<i32>} : memref<1x128xf32, #tpu.memory_space<vmem>>, vector<1x128xf32>,
    %c0_62 = arith.constant 0 : index
    %c0_63 = arith.constant 0 : index
    %229 = vector.load %arg4[%c0_62, %c0_63] : memref<1x128xf32, #tpu.memory_space<vmem>>, vector<1x128xf32>
    %230 = arith.mulf %226, %229 : vector<1x128xf32>
    %cst_64 = arith.constant dense<0.000000e+00> : vector<1xf32>
    %231 = vector.multi_reduction <add>, %230, %cst_64 [1] : vector<1x128xf32> to vector<1xf32>
    %232 = vector.shape_cast %231 : vector<1xf32> to vector<1x1xf32>
    %c0_65 = arith.constant 0 : index
    %c0_66 = arith.constant 0 : index
    %233 = vector.load %arg5[%c0_65, %c0_66] : memref<1x1xf32, #tpu.memory_space<vmem>>, vector<1x1xf32>
    %234 = arith.addf %232, %233 : vector<1x1xf32>
    %c0_67 = arith.constant 0 : index
    %c0_68 = arith.constant 0 : index
    %235 = vector.load %arg8[%c0_67, %c0_68] : memref<1x1xf32, #tpu.memory_space<vmem>>, vector<1x1xf32>
    tpu.vector_store %arg8[%c0_67, %c0_68], %234 {strides = array<i32>} : memref<1x1xf32, #tpu.memory_space<vmem>>, vector<1x1xf32>,
    return
  }
}

</mosaic_0001>

<bundles_post_ra>
// kernel: lstm_forward.1
= control target key start
LH: loop header
LB: loop body
LE: loop exit
PB: predicated region body
PF: predicated region fallthrough
CT: control target
= control target key end

     0   :  { %s2192_s0 = inlined_call_operand.vmem [shape: f32[8,1], index: 0, kind: input, shape index: {}]   ;;  %s2193_s1 = inlined_call_operand.vmem [shape: f32[1,512], index: 1, kind: input, shape index: {}]   ;;  %s2194_s2 = inlined_call_operand.vmem [shape: f32[1,512], index: 2, kind: input, shape index: {}]   ;;  %s2195_s3 = inlined_call_operand.hbm [shape: bf16[128,512], index: 3, kind: input, shape index: {}]   ;;  %s2196_s4 = inlined_call_operand.vmem [shape: f32[1,128], index: 4, kind: input, shape index: {}]   ;;  %s2197_s5 = inlined_call_operand.<no memory space> [shape: f32[1,1], index: 5, kind: input, shape index: {}]   ;;  %s2198_s6 = inlined_call_operand.vmem [shape: f32[1,128], index: 6, kind: input, shape index: {}, may-alias: {6,9}]   ;;  %s2199_s7 = inlined_call_operand.vmem [shape: f32[1,128], index: 7, kind: input, shape index: {}, may-alias: {7,10}]   ;;  %s2200_s8 = inlined_call_operand.hbm [shape: f32[1,1], index: 8, kind: output, shape index: {0}]   ;;  %s2201_s9 = inlined_call_operand.vmem [shape: f32[1,128], index: 9, kind: output, shape index: {1}, may-alias: {6,9}]   ;;  %s2202_s10 = inlined_call_operand.vmem [shape: f32[1,128], index: 10, kind: output, shape index: {2}, may-alias: {7,10}]  }
   0x1   :  { %v16_v0 = vstv %s2197_s5 }
   0x2   :  { %17 = vst [vmem:[#allocation3] sm:$0x1] %v16_v0 }
   0x3   :  { %18 = vsyncpa [#allocation5], 0 }
   0x4   :  { %19 = vsyncpa [#allocation6], 0  ;;  %s1743_s15 = smov [#allocation4]  }
   0x5   :  { %s31_s16 = sshll.u32 %s1743_s15, 4  ;;  %s32_s16 = int_to_ptr.vmem [resolvable:$true] %s31_s16 }
   0x6   :  { %s1707_s17 = scalar_lea.vmem %s32_s16, 4096  ;;  %p1712_p1 = scmp.lt.s32.totalorder %s32_s16, %s32_s16 }
   0x7   :  { %p1708_p0 = scmp.ne.s32.totalorder %s32_s16, %s1707_s17  ;;  %p1713_p2 = scmp.lt.s32.totalorder %s1707_s17, %s1707_s17 }
   0x9   :  { %p1714_p3 = por %p1713_p2, %p1712_p1 }
   0xb   :  { %p1715_p4 = pnand %p1714_p3, %p1708_p0 }
   0xd   :  { %1718 = shalt.err (!%p1715_p4)
}
   0xe   :  { %s1744_s18 = smov 256   ;;  %s1745_s19 = smov 16  }
   0xf   :  { %37 = dma.hbm_to_vmem [thread:$0]  %s2195_s3, 4096, %s32_s16, [#allocation5], %s1744_s18, %s1744_s18, %s1745_s19  }
  0x10   :  { %1739 = dma.done.wait [#allocation5], 4096  }
  0x11   :  { %1740 = vsyncadd [#allocation5], 4294963200  ;;  %v1746_v1 = vmov 0   ;;  %v1813_v2 = vld [vmem:[#allocation4 + $0xe4] ss:$16 sps:$4 sm:$0xff]   ;;  %v58_v37 = vlaneseq  ;;  %vm1437_vm0 = vcmask 1040384  }
  0x12   :  { %340 = vmatprep.mubr.bf16.mxu0 %v1746_v1  ;;  %381 = vmatprep.mubr.bf16.mxu1 %v1746_v1  ;;  %v1815_v3 = vld [vmem:[#allocation4 + $0xec] ss:$16 sps:$4 sm:$0xff]   ;;  %v1818_v4 = vld [vmem:[#allocation4 + $0xe0] ss:$16 sps:$4 sm:$0xff]   ;;  %v1820_v5 = vld [vmem:[#allocation4 + $0xe8] ss:$16 sps:$4 sm:$0xff]  }
  0x13   :  { %1522 = vset.pattern.permute.xlu0 %v1746_v1  ;;  %308 = vmatprep.subr.bf16.mxu0 %v1813_v2  ;;  %v1823_v6 = vld [vmem:[#allocation4 + $0xc4] ss:$16 sps:$4 sm:$0xff]   ;;  %v1827_v7 = vld [vmem:[#allocation4 + $0xcc] ss:$16 sps:$4 sm:$0xff]   ;;  %v1829_v8 = vld [vmem:[#allocation4 + $0xc0] ss:$16 sps:$4 sm:$0xff]  }
  0x14   :  { %349 = vmatprep.subr.bf16.mxu1 %v1815_v3  ;;  %309 = vmatpush1.bf16.msra.mxu0 %v1818_v4  ;;  %v1832_v9 = vld [vmem:[#allocation4 + $0xc8] ss:$16 sps:$4 sm:$0xff]   ;;  %v1835_v10 = vld [vmem:[#allocation4 + $0xa4] ss:$16 sps:$4 sm:$0xff]   ;;  %v1837_v11 = vld [vmem:[#allocation4 + $0xac] ss:$16 sps:$4 sm:$0xff]  }
  0x15   :  { %350 = vmatpush1.bf16.msra.mxu1 %v1820_v5  ;;  %310 = vmatprep.subr.bf16.mxu0 %v1823_v6  ;;  %v1839_v12 = vld [vmem:[#allocation4 + $0xa0] ss:$16 sps:$4 sm:$0xff]   ;;  %v1841_v13 = vld [vmem:[#allocation4 + $0xa8] ss:$16 sps:$4 sm:$0xff]   ;;  %v1845_v14 = vld [vmem:[#allocation4 + $0x84] ss:$16 sps:$4 sm:$0xff]  }
  0x16   :  { %351 = vmatprep.subr.bf16.mxu1 %v1827_v7  ;;  %v1849_v15 = vld [vmem:[#allocation4 + $0x8c] ss:$16 sps:$4 sm:$0xff]   ;;  %v1851_v16 = vld [vmem:[#allocation4 + $0x80] ss:$16 sps:$4 sm:$0xff]   ;;  %v1855_v17 = vld [vmem:[#allocation4 + $0x88] ss:$16 sps:$4 sm:$0xff]  }
  0x17   :  { %v1857_v18 = vld [vmem:[#allocation4 + $0x64] ss:$16 sps:$4 sm:$0xff]   ;;  %v1861_v19 = vld [vmem:[#allocation4 + $0x6c] ss:$16 sps:$4 sm:$0xff]   ;;  %v1863_v20 = vld [vmem:[#allocation4 + $0x60] ss:$16 sps:$4 sm:$0xff]  }
  0x18   :  { %311 = vmatpush1.bf16.msra.mxu0 %v1829_v8  ;;  %v1865_v21 = vld [vmem:[#allocation4 + $0x68] ss:$16 sps:$4 sm:$0xff]   ;;  %v1869_v22 = vld [vmem:[#allocation4 + $0x44] ss:$16 sps:$4 sm:$0xff]   ;;  %v1873_v23 = vld [vmem:[#allocation4 + $0x4c] ss:$16 sps:$4 sm:$0xff]  }
  0x19   :  { %352 = vmatpush1.bf16.msra.mxu1 %v1832_v9  ;;  %312 = vmatprep.subr.bf16.mxu0 %v1835_v10  ;;  %v1877_v24 = vld [vmem:[#allocation4 + $0x40] ss:$16 sps:$4 sm:$0xff]   ;;  %v1879_v25 = vld [vmem:[#allocation4 + $0x48] ss:$16 sps:$4 sm:$0xff]   ;;  %v1883_v26 = vld [vmem:[#allocation4 + $0x24] ss:$16 sps:$4 sm:$0xff]  }
  0x1a   :  { %353 = vmatprep.subr.bf16.mxu1 %v1837_v11  ;;  %v1885_v27 = vld [vmem:[#allocation4 + $0x2c] ss:$16 sps:$4 sm:$0xff]   ;;  %v1892_v29 = vld [vmem:[#allocation4 + $0x20] ss:$16 sps:$4 sm:$0xff]   ;;  %v1894_v30 = vld [vmem:[#allocation4 + $0x28] ss:$16 sps:$4 sm:$0xff]  }
  0x1b   :  { %v50_v28 = vld [vmem:[%s2192_s0] sm:$0xff]  ;;  %v1906_v34 = vld [vmem:[#allocation4 + $0x8] ss:$16 sps:$4 sm:$0xff]   ;;  %v59_v38 = vshrl.u32 %v58_v37, 7  ;;  %v1747_v62 = vmov 1966171168  }
  0x1c   :  { %313 = vmatpush1.bf16.msra.mxu0 %v1839_v12  ;;  %54 = vperm.xlu0 %1522, %v50_v28   ;;  %v1898_v31 = vld [vmem:[#allocation4 + $0x4] ss:$16 sps:$4 sm:$0xff]   ;;  %v1900_v32 = vld [vmem:[#allocation4 + $0xc] ss:$16 sps:$4 sm:$0xff]   ;;  %v1904_v33 = vld [vmem:[#allocation4] ss:$16 sps:$4 sm:$0xff]   ;;  %v397_v63 = vunpack.c.l.s4 %v1747_v62 }
  0x1d   :  { %354 = vmatpush1.bf16.msra.mxu1 %v1841_v13  ;;  %314 = vmatprep.subr.bf16.mxu0 %v1845_v14  ;;  %v112_v35 = vld [vmem:[%s2198_s6] sm:$0x1]  ;;  %v60_v39 = vsub.s32 0, %v59_v38  ;;  %v64_v40 = vsub.s32 1, %v59_v38  ;;  %v68_v41 = vsub.s32 2, %v59_v38  ;;  %v72_v42 = vsub.s32 3, %v59_v38 }
  0x1e   :  { %355 = vmatprep.subr.bf16.mxu1 %v1849_v15  ;;  %v115_v36 = vpack.c.bf16 %v112_v35, %v112_v35  ;;  %v51_v43 = vld [vmem:[%s2193_s1] sm:$0xf]  ;;  %v398_v0 = vunpack.c.0.s8 %v397_v63  ;;  %s1748_s11 = smov [#allocation7]   ;;  %vm1443_vm1 = vcmask 0  }
  0x1f   :  { %v82_v44 = vld [vmem:[%s2194_s2] sm:$0xf]  ;;  %v61_v45 = vrot.slane %v51_v43, %v60_v39  ;;  %v65_v46 = vrot.slane %v51_v43, %v64_v40  ;;  %v69_v47 = vrot.slane %v51_v43, %v68_v41  ;;  %v73_v48 = vrot.slane %v51_v43, %v72_v42  ;;  %s1451_s12 = sshll.u32 %s1748_s11, 4  ;;  %s1452_s12 = int_to_ptr.vmem [resolvable:$true] %s1451_s12 }
  0x20   :  { %315 = vmatpush1.bf16.msra.mxu0 %v1851_v16  ;;  %v87_v49 = vrot.slane %v82_v44, %v60_v39  ;;  %v91_v50 = vrot.slane %v82_v44, %v64_v40  ;;  %v95_v51 = vrot.slane %v82_v44, %v68_v41  ;;  %v99_v52 = vrot.slane %v82_v44, %v72_v42  ;;  %p1724_p6 = scmp.lt.s32.totalorder %s1452_s12, %s1452_s12 }
  0x21   :  { %356 = vmatpush1.bf16.msra.mxu1 %v1855_v17  ;;  %316 = vmatprep.subr.bf16.mxu0 %v1857_v18 }
  0x22   :  { %357 = vmatprep.subr.bf16.mxu1 %v1861_v19 }
  0x24   :  { %317 = vmatpush1.bf16.msra.mxu0 %v1863_v20 }
  0x25   :  { %358 = vmatpush1.bf16.msra.mxu1 %v1865_v21  ;;  %318 = vmatprep.subr.bf16.mxu0 %v1869_v22 }
  0x26   :  { %359 = vmatprep.subr.bf16.mxu1 %v1873_v23 }
  0x28   :  { %319 = vmatpush1.bf16.msra.mxu0 %v1877_v24 }
  0x29   :  { %360 = vmatpush1.bf16.msra.mxu1 %v1879_v25  ;;  %320 = vmatprep.subr.bf16.mxu0 %v1883_v26 }
  0x2a   :  { %361 = vmatprep.subr.bf16.mxu1 %v1885_v27 }
  0x2c   :  { %321 = vmatpush1.bf16.msra.mxu0 %v1892_v29 }
  0x2d   :  { %362 = vmatpush1.bf16.msra.mxu1 %v1894_v30  ;;  %322 = vmatprep.subr.bf16.mxu0 %v1898_v31 }
  0x2e   :  { %363 = vmatprep.subr.bf16.mxu1 %v1900_v32 }
  0x30   :  { %323 = vmatpush1.bf16.msra.mxu0 %v1904_v33 }
  0x31   :  { %364 = vmatpush1.bf16.msra.mxu1 %v1906_v34  ;;  %449 = vmatprep.subr.bf16.mxu0 %v1813_v2 }
  0x32   :  { %490 = vmatprep.subr.bf16.mxu1 %v1815_v3 }
  0x33   :  { %341 = vmatmul.mubr.bf16.vlgmr.msra.gmra.mxu0 %v115_v36 }
  0x34   :  { %382 = vmatmul.mubr.bf16.vlgmr.msra.gmra.mxu1 %v115_v36  ;;  %450 = vmatpush1.bf16.msra.mxu0 %v1818_v4  ;;  %v1957_v36 = vsub.s32 %v398_v0, %v59_v38 }
  0x35   :  { %491 = vmatpush1.bf16.msra.mxu1 %v1820_v5  ;;  %451 = vmatprep.subr.bf16.mxu0 %v1823_v6 }
  0x36   :  { %492 = vmatprep.subr.bf16.mxu1 %v1827_v7  ;;  %481 = vmatprep.mubr.bf16.mxu0 %v1746_v1 }
  0x37   :  { %522 = vmatprep.mubr.bf16.mxu1 %v1746_v1 }
  0x38   :  { %452 = vmatpush1.bf16.msra.mxu0 %v1829_v8 }
  0x39   :  { %493 = vmatpush1.bf16.msra.mxu1 %v1832_v9  ;;  %453 = vmatprep.subr.bf16.mxu0 %v1835_v10 }
  0x3a   :  { %494 = vmatprep.subr.bf16.mxu1 %v1837_v11 }
  0x3c   :  { %454 = vmatpush1.bf16.msra.mxu0 %v1839_v12 }
  0x3d   :  { %495 = vmatpush1.bf16.msra.mxu1 %v1841_v13  ;;  %455 = vmatprep.subr.bf16.mxu0 %v1845_v14 }
  0x3e   :  { %496 = vmatprep.subr.bf16.mxu1 %v1849_v15 }
  0x40   :  { %456 = vmatpush1.bf16.msra.mxu0 %v1851_v16 }
  0x41   :  { %497 = vmatpush1.bf16.msra.mxu1 %v1855_v17  ;;  %457 = vmatprep.subr.bf16.mxu0 %v1857_v18 }
  0x42   :  { %498 = vmatprep.subr.bf16.mxu1 %v1861_v19 }
  0x44   :  { %458 = vmatpush1.bf16.msra.mxu0 %v1863_v20 }
  0x45   :  { %499 = vmatpush1.bf16.msra.mxu1 %v1865_v21  ;;  %459 = vmatprep.subr.bf16.mxu0 %v1869_v22 }
  0x46   :  { %500 = vmatprep.subr.bf16.mxu1 %v1873_v23 }
  0x48   :  { %460 = vmatpush1.bf16.msra.mxu0 %v1877_v24 }
  0x49   :  { %501 = vmatpush1.bf16.msra.mxu1 %v1879_v25  ;;  %461 = vmatprep.subr.bf16.mxu0 %v1883_v26 }
  0x4a   :  { %502 = vmatprep.subr.bf16.mxu1 %v1885_v27 }
  0x4c   :  { %462 = vmatpush1.bf16.msra.mxu0 %v1892_v29 }
  0x4d   :  { %503 = vmatpush1.bf16.msra.mxu1 %v1894_v30  ;;  %463 = vmatprep.subr.bf16.mxu0 %v1898_v31 }
  0x4e   :  { %504 = vmatprep.subr.bf16.mxu1 %v1900_v32 }
  0x50   :  { %464 = vmatpush1.bf16.msra.mxu0 %v1904_v33 }
  0x51   :  { %505 = vmatpush1.bf16.msra.mxu1 %v1906_v34  ;;  %590 = vmatprep.subr.bf16.mxu0 %v1813_v2 }
  0x52   :  { %631 = vmatprep.subr.bf16.mxu1 %v1815_v3 }
  0x97   :  { %v55_v53 = vpop.permute.xlu0 %54 }
  0x98   :  { %v78_v54 = vmul.f32 %v61_v45, %v55_v53  ;;  %v79_v55 = vmul.f32 %v65_v46, %v55_v53  ;;  %v80_v56 = vmul.f32 %v69_v47, %v55_v53  ;;  %v81_v57 = vmul.f32 %v73_v48, %v55_v53 }
  0x9a   :  { %v104_v58 = vadd.f32 %v87_v49, %v78_v54  ;;  %v105_v59 = vadd.f32 %v91_v50, %v79_v55  ;;  %v106_v60 = vadd.f32 %v95_v51, %v80_v56  ;;  %v107_v61 = vadd.f32 %v99_v52, %v81_v57 }
  0x9c   :  { %108 = vst [vmem:[#allocation2] sm:$0xff] %v104_v58  ;;  %109 = vst [vmem:[#allocation2 + $0x8] sm:$0xff] %v105_v59  ;;  %v113_v59 = vld [vmem:[%s2199_s7] sm:$0x1] }
  0x9d   :  { %110 = vst [vmem:[#allocation2 + $0x10] sm:$0xff] %v106_v60  ;;  %111 = vst [vmem:[#allocation2 + $0x18] sm:$0xff] %v107_v61 }
  0xa4   :  { %v114_v49 = vld [vmem:[#allocation2] ss:$8 sm:$0xf] }
  0xf3   :  { %v342_v28 = vpop.f32.mrf.mxu0 }
  0xf4   :  { %v383_v35 = vpop.f32.mrf.mxu1 }
  0xf5   :  { %v344_v37 = vpop.f32.mrf.mxu0 }
  0xf6   :  { %v385_v39 = vpop.f32.mrf.mxu1  ;;  %v394_v40 = vcombine.low %v342_v28, %v344_v37 }
  0xf7   :  { %v395_v41 = vcombine.low %v383_v35, %v385_v39  ;;  %v346_v42 = vpop.f32.mrf.mxu0 }
  0xf8   :  { %v387_v43 = vpop.f32.mrf.mxu1  ;;  %v402_v44 = vrot.slane %v394_v40, %v1957_v36 }
  0xf9   :  { %v409_v45 = vrot.slane %v395_v41, %v1957_v36  ;;  %v347_v46 = vpop.f32.mrf.mxu0 }
  0xfa   :  { %v388_v47 = vpop.f32.mrf.mxu1 }
  0xfb   :  { %v410_v48 = vcombine.low %v402_v44, %v409_v45 }
  0xfd   :  { %v417_v50 = vrot.slane %v410_v48, %v1957_v36 }
  0xff   :  { %v419_v51 = vadd.f32 %v417_v50, %v114_v49 }
 0x101   :  { %v1500_v52 = vmul.f32 -1.442695, %v419_v51  ;;  %v436_v38 = vrot.slane %v419_v51, 2  ;;  %v427_v56 = vrot.slane %v419_v51, 3 }
 0x103   :  { %1571 = vpow2.f32 %v1500_v52  ;;  %v1501_v53 = vmul.f32 -1.442695, %v436_v38 }
 0x105   :  { %1573 = vpow2.f32 %v1501_v53 }
 0x110   :  { %v1572_v54 = vpop.eup %1571 }
 0x111   :  { %v423_v55 = vadd.f32 1.0, %v1572_v54  ;;  %v447_v54 = vld [vmem:[#allocation2 + $0x1] ss:$8 sm:$0xf] }
 0x112   :  { %v1574_v57 = vpop.eup %1573 }
 0x113   :  { %1575 = vrcp.f32 %v423_v55  ;;  %v441_v62 = vadd.f32 1.0, %v1574_v57 }
 0x114   :  { %1577 = vtanh.f32 %v427_v56 }
 0x115   :  { %1579 = vrcp.f32 %v441_v62 }
 0x120   :  { %v1576_v58 = vpop.eup %1575 }
 0x121   :  { %v431_v60 = vrot.slane %v1576_v58, 1  ;;  %v1578_v61 = vpop.eup %1577 }
 0x122   :  { %v434_v0 = vmul.f32 %v1578_v61, %v1576_v58  ;;  %v1580_v35 = vpop.eup %1579 }
 0x123   :  { %v433_v63 = vmul.f32 %v431_v60, %v113_v59 }
 0x125   :  { %v1965_v28 = vadd.f32 %v434_v0, %v433_v63 }
 0x127   :  { %1581 = vtanh.f32 %v1965_v28 }
 0x134   :  { %v1582_v37 = vpop.eup %1581 }
 0x135   :  { %v445_v39 = vmul.f32 %v1582_v37, %v1580_v35 }
 0x137   :  { %v448_v40 = vpack.c.bf16 %v445_v39, %v445_v39 }
 0x139   :  { %482 = vmatmul.mubr.bf16.vlgmr.msra.gmra.mxu0 %v448_v40  ;;  %523 = vmatmul.mubr.bf16.vlgmr.msra.gmra.mxu1 %v448_v40 }
 0x13a   :  { %591 = vmatpush1.bf16.msra.mxu0 %v1818_v4  ;;  %632 = vmatpush1.bf16.msra.mxu1 %v1820_v5 }
 0x13b   :  { %592 = vmatprep.subr.bf16.mxu0 %v1823_v6  ;;  %633 = vmatprep.subr.bf16.mxu1 %v1827_v7 }
 0x13c   :  { %622 = vmatprep.mubr.bf16.mxu0 %v1746_v1  ;;  %663 = vmatprep.mubr.bf16.mxu1 %v1746_v1 }
 0x13e   :  { %593 = vmatpush1.bf16.msra.mxu0 %v1829_v8  ;;  %634 = vmatpush1.bf16.msra.mxu1 %v1832_v9 }
 0x13f   :  { %594 = vmatprep.subr.bf16.mxu0 %v1835_v10  ;;  %635 = vmatprep.subr.bf16.mxu1 %v1837_v11 }
 0x142   :  { %595 = vmatpush1.bf16.msra.mxu0 %v1839_v12  ;;  %636 = vmatpush1.bf16.msra.mxu1 %v1841_v13 }
 0x143   :  { %596 = vmatprep.subr.bf16.mxu0 %v1845_v14  ;;  %637 = vmatprep.subr.bf16.mxu1 %v1849_v15 }
 0x146   :  { %597 = vmatpush1.bf16.msra.mxu0 %v1851_v16  ;;  %638 = vmatpush1.bf16.msra.mxu1 %v1855_v17 }
 0x147   :  { %598 = vmatprep.subr.bf16.mxu0 %v1857_v18  ;;  %639 = vmatprep.subr.bf16.mxu1 %v1861_v19 }
 0x14a   :  { %599 = vmatpush1.bf16.msra.mxu0 %v1863_v20  ;;  %640 = vmatpush1.bf16.msra.mxu1 %v1865_v21 }
 0x14b   :  { %600 = vmatprep.subr.bf16.mxu0 %v1869_v22  ;;  %641 = vmatprep.subr.bf16.mxu1 %v1873_v23 }
 0x14e   :  { %601 = vmatpush1.bf16.msra.mxu0 %v1877_v24  ;;  %642 = vmatpush1.bf16.msra.mxu1 %v1879_v25 }
 0x14f   :  { %602 = vmatprep.subr.bf16.mxu0 %v1883_v26  ;;  %643 = vmatprep.subr.bf16.mxu1 %v1885_v27 }
 0x152   :  { %603 = vmatpush1.bf16.msra.mxu0 %v1892_v29  ;;  %644 = vmatpush1.bf16.msra.mxu1 %v1894_v30 }
 0x153   :  { %604 = vmatprep.subr.bf16.mxu0 %v1898_v31  ;;  %645 = vmatprep.subr.bf16.mxu1 %v1900_v32 }
 0x156   :  { %605 = vmatpush1.bf16.msra.mxu0 %v1904_v33  ;;  %646 = vmatpush1.bf16.msra.mxu1 %v1906_v34 }
 0x157   :  { %731 = vmatprep.subr.bf16.mxu0 %v1813_v2  ;;  %772 = vmatprep.subr.bf16.mxu1 %v1815_v3 }
 0x1f9   :  { %v483_v41 = vpop.f32.mrf.mxu0  ;;  %v524_v42 = vpop.f32.mrf.mxu1 }
 0x1fb   :  { %v485_v43 = vpop.f32.mrf.mxu0  ;;  %v526_v44 = vpop.f32.mrf.mxu1 }
 0x1fc   :  { %v535_v45 = vcombine.low %v483_v41, %v485_v43  ;;  %v536_v46 = vcombine.low %v524_v42, %v526_v44 }
 0x1fd   :  { %v487_v47 = vpop.f32.mrf.mxu0  ;;  %v528_v48 = vpop.f32.mrf.mxu1 }
 0x1fe   :  { %v543_v49 = vrot.slane %v535_v45, %v1957_v36  ;;  %v550_v50 = vrot.slane %v536_v46, %v1957_v36 }
 0x1ff   :  { %v488_v51 = vpop.f32.mrf.mxu0  ;;  %v529_v52 = vpop.f32.mrf.mxu1 }
 0x200   :  { %v551_v38 = vcombine.low %v543_v49, %v550_v50 }
 0x202   :  { %v558_v53 = vrot.slane %v551_v38, %v1957_v36 }
 0x204   :  { %v560_v55 = vadd.f32 %v558_v53, %v447_v54 }
 0x206   :  { %v1502_v56 = vmul.f32 -1.442695, %v560_v55  ;;  %v577_v57 = vrot.slane %v560_v55, 2  ;;  %v568_v61 = vrot.slane %v560_v55, 3 }
 0x208   :  { %1583 = vpow2.f32 %v1502_v56  ;;  %v1503_v58 = vmul.f32 -1.442695, %v577_v57 }
 0x20a   :  { %1585 = vpow2.f32 %v1503_v58  ;;  %v588_v58 = vld [vmem:[#allocation2 + $0x2] ss:$8 sm:$0xf] }
 0x215   :  { %v1584_v59 = vpop.eup %1583 }
 0x216   :  { %v564_v60 = vadd.f32 1.0, %v1584_v59 }
 0x217   :  { %v1586_v62 = vpop.eup %1585 }
 0x218   :  { %1587 = vrcp.f32 %v564_v60  ;;  %v582_v37 = vadd.f32 1.0, %v1586_v62 }
 0x219   :  { %1589 = vtanh.f32 %v568_v61 }
 0x21a   :  { %1591 = vrcp.f32 %v582_v37 }
 0x225   :  { %v1588_v63 = vpop.eup %1587 }
 0x226   :  { %v572_v0 = vrot.slane %v1588_v63, 1  ;;  %v1590_v35 = vpop.eup %1589 }
 0x227   :  { %v575_v40 = vmul.f32 %v1590_v35, %v1588_v63  ;;  %v1592_v42 = vpop.eup %1591 }
 0x228   :  { %v574_v39 = vmul.f32 %v572_v0, %v1965_v28 }
 0x22a   :  { %v2006_v41 = vadd.f32 %v575_v40, %v574_v39 }
 0x22c   :  { %1593 = vtanh.f32 %v2006_v41 }
 0x239   :  { %v1594_v43 = vpop.eup %1593 }
 0x23a   :  { %v586_v44 = vmul.f32 %v1594_v43, %v1592_v42 }
 0x23c   :  { %v589_v45 = vpack.c.bf16 %v586_v44, %v586_v44 }
 0x23e   :  { %623 = vmatmul.mubr.bf16.vlgmr.msra.gmra.mxu0 %v589_v45  ;;  %664 = vmatmul.mubr.bf16.vlgmr.msra.gmra.mxu1 %v589_v45 }
 0x23f   :  { %732 = vmatpush1.bf16.msra.mxu0 %v1818_v4  ;;  %773 = vmatpush1.bf16.msra.mxu1 %v1820_v5 }
 0x240   :  { %733 = vmatprep.subr.bf16.mxu0 %v1823_v6  ;;  %774 = vmatprep.subr.bf16.mxu1 %v1827_v7 }
 0x241   :  { %763 = vmatprep.mubr.bf16.mxu0 %v1746_v1  ;;  %804 = vmatprep.mubr.bf16.mxu1 %v1746_v1 }
 0x243   :  { %734 = vmatpush1.bf16.msra.mxu0 %v1829_v8  ;;  %775 = vmatpush1.bf16.msra.mxu1 %v1832_v9 }
 0x244   :  { %735 = vmatprep.subr.bf16.mxu0 %v1835_v10  ;;  %776 = vmatprep.subr.bf16.mxu1 %v1837_v11 }
 0x247   :  { %736 = vmatpush1.bf16.msra.mxu0 %v1839_v12  ;;  %777 = vmatpush1.bf16.msra.mxu1 %v1841_v13 }
 0x248   :  { %737 = vmatprep.subr.bf16.mxu0 %v1845_v14  ;;  %778 = vmatprep.subr.bf16.mxu1 %v1849_v15 }
 0x24b   :  { %738 = vmatpush1.bf16.msra.mxu0 %v1851_v16  ;;  %779 = vmatpush1.bf16.msra.mxu1 %v1855_v17 }
 0x24c   :  { %739 = vmatprep.subr.bf16.mxu0 %v1857_v18  ;;  %780 = vmatprep.subr.bf16.mxu1 %v1861_v19 }
 0x24f   :  { %740 = vmatpush1.bf16.msra.mxu0 %v1863_v20  ;;  %781 = vmatpush1.bf16.msra.mxu1 %v1865_v21 }
 0x250   :  { %741 = vmatprep.subr.bf16.mxu0 %v1869_v22  ;;  %782 = vmatprep.subr.bf16.mxu1 %v1873_v23 }
 0x253   :  { %742 = vmatpush1.bf16.msra.mxu0 %v1877_v24  ;;  %783 = vmatpush1.bf16.msra.mxu1 %v1879_v25 }
 0x254   :  { %743 = vmatprep.subr.bf16.mxu0 %v1883_v26  ;;  %784 = vmatprep.subr.bf16.mxu1 %v1885_v27 }
 0x257   :  { %744 = vmatpush1.bf16.msra.mxu0 %v1892_v29  ;;  %785 = vmatpush1.bf16.msra.mxu1 %v1894_v30 }
 0x258   :  { %745 = vmatprep.subr.bf16.mxu0 %v1898_v31  ;;  %786 = vmatprep.subr.bf16.mxu1 %v1900_v32 }
 0x25b   :  { %746 = vmatpush1.bf16.msra.mxu0 %v1904_v33  ;;  %787 = vmatpush1.bf16.msra.mxu1 %v1906_v34 }
 0x25c   :  { %872 = vmatprep.subr.bf16.mxu0 %v1813_v2  ;;  %913 = vmatprep.subr.bf16.mxu1 %v1815_v3 }
 0x2fe   :  { %v624_v28 = vpop.f32.mrf.mxu0  ;;  %v665_v46 = vpop.f32.mrf.mxu1 }
 0x300   :  { %v626_v47 = vpop.f32.mrf.mxu0  ;;  %v667_v48 = vpop.f32.mrf.mxu1 }
 0x301   :  { %v676_v49 = vcombine.low %v624_v28, %v626_v47  ;;  %v677_v50 = vcombine.low %v665_v46, %v667_v48 }
 0x302   :  { %v628_v51 = vpop.f32.mrf.mxu0  ;;  %v669_v52 = vpop.f32.mrf.mxu1 }
 0x303   :  { %v684_v38 = vrot.slane %v676_v49, %v1957_v36  ;;  %v691_v53 = vrot.slane %v677_v50, %v1957_v36 }
 0x304   :  { %v629_v54 = vpop.f32.mrf.mxu0  ;;  %v670_v55 = vpop.f32.mrf.mxu1 }
 0x305   :  { %v692_v56 = vcombine.low %v684_v38, %v691_v53 }
 0x307   :  { %v699_v57 = vrot.slane %v692_v56, %v1957_v36 }
 0x309   :  { %v701_v59 = vadd.f32 %v699_v57, %v588_v58 }
 0x30b   :  { %v1504_v60 = vmul.f32 -1.442695, %v701_v59  ;;  %v718_v61 = vrot.slane %v701_v59, 2  ;;  %v709_v35 = vrot.slane %v701_v59, 3 }
 0x30d   :  { %1595 = vpow2.f32 %v1504_v60  ;;  %v1505_v62 = vmul.f32 -1.442695, %v718_v61 }
 0x30f   :  { %1597 = vpow2.f32 %v1505_v62  ;;  %v729_v62 = vld [vmem:[#allocation2 + $0x3] ss:$8 sm:$0xf] }
 0x31a   :  { %v1596_v63 = vpop.eup %1595 }
 0x31b   :  { %v705_v0 = vadd.f32 1.0, %v1596_v63 }
 0x31c   :  { %v1598_v37 = vpop.eup %1597 }
 0x31d   :  { %1599 = vrcp.f32 %v705_v0  ;;  %v723_v43 = vadd.f32 1.0, %v1598_v37 }
 0x31e   :  { %1601 = vtanh.f32 %v709_v35 }
 0x31f   :  { %1603 = vrcp.f32 %v723_v43 }
 0x32a   :  { %v1600_v39 = vpop.eup %1599 }
 0x32b   :  { %v713_v40 = vrot.slane %v1600_v39, 1  ;;  %v1602_v42 = vpop.eup %1601 }
 0x32c   :  { %v716_v45 = vmul.f32 %v1602_v42, %v1600_v39  ;;  %v1604_v46 = vpop.eup %1603 }
 0x32d   :  { %v715_v44 = vmul.f32 %v713_v40, %v2006_v41 }
 0x32f   :  { %v2047_v28 = vadd.f32 %v716_v45, %v715_v44 }
 0x331   :  { %1605 = vtanh.f32 %v2047_v28 }
 0x33e   :  { %v1606_v47 = vpop.eup %1605 }
 0x33f   :  { %v727_v48 = vmul.f32 %v1606_v47, %v1604_v46 }
 0x341   :  { %v730_v49 = vpack.c.bf16 %v727_v48, %v727_v48 }
 0x343   :  { %764 = vmatmul.mubr.bf16.vlgmr.msra.gmra.mxu0 %v730_v49  ;;  %805 = vmatmul.mubr.bf16.vlgmr.msra.gmra.mxu1 %v730_v49 }
 0x344   :  { %873 = vmatpush1.bf16.msra.mxu0 %v1818_v4  ;;  %914 = vmatpush1.bf16.msra.mxu1 %v1820_v5 }
 0x345   :  { %874 = vmatprep.subr.bf16.mxu0 %v1823_v6  ;;  %915 = vmatprep.subr.bf16.mxu1 %v1827_v7 }
 0x346   :  { %904 = vmatprep.mubr.bf16.mxu0 %v1746_v1  ;;  %945 = vmatprep.mubr.bf16.mxu1 %v1746_v1 }
 0x348   :  { %875 = vmatpush1.bf16.msra.mxu0 %v1829_v8  ;;  %916 = vmatpush1.bf16.msra.mxu1 %v1832_v9 }
 0x349   :  { %876 = vmatprep.subr.bf16.mxu0 %v1835_v10  ;;  %917 = vmatprep.subr.bf16.mxu1 %v1837_v11 }
 0x34c   :  { %877 = vmatpush1.bf16.msra.mxu0 %v1839_v12  ;;  %918 = vmatpush1.bf16.msra.mxu1 %v1841_v13 }
 0x34d   :  { %878 = vmatprep.subr.bf16.mxu0 %v1845_v14  ;;  %919 = vmatprep.subr.bf16.mxu1 %v1849_v15 }
 0x350   :  { %879 = vmatpush1.bf16.msra.mxu0 %v1851_v16  ;;  %920 = vmatpush1.bf16.msra.mxu1 %v1855_v17 }
 0x351   :  { %880 = vmatprep.subr.bf16.mxu0 %v1857_v18  ;;  %921 = vmatprep.subr.bf16.mxu1 %v1861_v19 }
 0x354   :  { %881 = vmatpush1.bf16.msra.mxu0 %v1863_v20  ;;  %922 = vmatpush1.bf16.msra.mxu1 %v1865_v21 }
 0x355   :  { %882 = vmatprep.subr.bf16.mxu0 %v1869_v22  ;;  %923 = vmatprep.subr.bf16.mxu1 %v1873_v23 }
 0x358   :  { %883 = vmatpush1.bf16.msra.mxu0 %v1877_v24  ;;  %924 = vmatpush1.bf16.msra.mxu1 %v1879_v25 }
 0x359   :  { %884 = vmatprep.subr.bf16.mxu0 %v1883_v26  ;;  %925 = vmatprep.subr.bf16.mxu1 %v1885_v27 }
 0x35c   :  { %885 = vmatpush1.bf16.msra.mxu0 %v1892_v29  ;;  %926 = vmatpush1.bf16.msra.mxu1 %v1894_v30 }
 0x35d   :  { %886 = vmatprep.subr.bf16.mxu0 %v1898_v31  ;;  %927 = vmatprep.subr.bf16.mxu1 %v1900_v32 }
 0x360   :  { %887 = vmatpush1.bf16.msra.mxu0 %v1904_v33  ;;  %928 = vmatpush1.bf16.msra.mxu1 %v1906_v34 }
 0x361   :  { %1013 = vmatprep.subr.bf16.mxu0 %v1813_v2  ;;  %1054 = vmatprep.subr.bf16.mxu1 %v1815_v3 }
 0x403   :  { %v765_v41 = vpop.f32.mrf.mxu0  ;;  %v806_v50 = vpop.f32.mrf.mxu1 }
 0x405   :  { %v767_v51 = vpop.f32.mrf.mxu0  ;;  %v808_v52 = vpop.f32.mrf.mxu1 }
 0x406   :  { %v817_v38 = vcombine.low %v765_v41, %v767_v51  ;;  %v818_v53 = vcombine.low %v806_v50, %v808_v52 }
 0x407   :  { %v769_v54 = vpop.f32.mrf.mxu0  ;;  %v810_v55 = vpop.f32.mrf.mxu1 }
 0x408   :  { %v825_v56 = vrot.slane %v817_v38, %v1957_v36  ;;  %v832_v57 = vrot.slane %v818_v53, %v1957_v36 }
 0x409   :  { %v770_v58 = vpop.f32.mrf.mxu0  ;;  %v811_v59 = vpop.f32.mrf.mxu1 }
 0x40a   :  { %v833_v60 = vcombine.low %v825_v56, %v832_v57 }
 0x40c   :  { %v840_v61 = vrot.slane %v833_v60, %v1957_v36 }
 0x40e   :  { %v842_v63 = vadd.f32 %v840_v61, %v729_v62 }
 0x410   :  { %v1506_v0 = vmul.f32 -1.442695, %v842_v63  ;;  %v859_v35 = vrot.slane %v842_v63, 2  ;;  %v850_v42 = vrot.slane %v842_v63, 3 }
 0x412   :  { %1607 = vpow2.f32 %v1506_v0  ;;  %v1507_v37 = vmul.f32 -1.442695, %v859_v35 }
 0x414   :  { %1609 = vpow2.f32 %v1507_v37 }
 0x41f   :  { %v1608_v39 = vpop.eup %1607 }
 0x420   :  { %v846_v40 = vadd.f32 1.0, %v1608_v39 }
 0x421   :  { %v1610_v43 = vpop.eup %1609 }
 0x422   :  { %1611 = vrcp.f32 %v846_v40  ;;  %v864_v47 = vadd.f32 1.0, %v1610_v43 }
 0x423   :  { %1613 = vtanh.f32 %v850_v42 }
 0x424   :  { %1615 = vrcp.f32 %v864_v47 }
 0x42f   :  { %v1612_v44 = vpop.eup %1611 }
 0x430   :  { %v854_v45 = vrot.slane %v1612_v44, 1  ;;  %v1614_v46 = vpop.eup %1613 }
 0x431   :  { %v857_v49 = vmul.f32 %v1614_v46, %v1612_v44  ;;  %v1616_v50 = vpop.eup %1615 }
 0x432   :  { %v856_v48 = vmul.f32 %v854_v45, %v2047_v28 }
 0x434   :  { %v2088_v41 = vadd.f32 %v857_v49, %v856_v48 }
 0x436   :  { %1617 = vtanh.f32 %v2088_v41 }
 0x443   :  { %v1618_v51 = vpop.eup %1617 }
 0x444   :  { %v868_v52 = vmul.f32 %v1618_v51, %v1616_v50 }
 0x446   :  { %v871_v38 = vpack.c.bf16 %v868_v52, %v868_v52 }
 0x448   :  { %905 = vmatmul.mubr.bf16.vlgmr.msra.gmra.mxu0 %v871_v38  ;;  %946 = vmatmul.mubr.bf16.vlgmr.msra.gmra.mxu1 %v871_v38 }
 0x449   :  { %1014 = vmatpush1.bf16.msra.mxu0 %v1818_v4  ;;  %1055 = vmatpush1.bf16.msra.mxu1 %v1820_v5 }
 0x44a   :  { %1015 = vmatprep.subr.bf16.mxu0 %v1823_v6  ;;  %1056 = vmatprep.subr.bf16.mxu1 %v1827_v7 }
 0x44b   :  { %1045 = vmatprep.mubr.bf16.mxu0 %v1746_v1  ;;  %1086 = vmatprep.mubr.bf16.mxu1 %v1746_v1 }
 0x44d   :  { %1016 = vmatpush1.bf16.msra.mxu0 %v1829_v8  ;;  %1057 = vmatpush1.bf16.msra.mxu1 %v1832_v9 }
 0x44e   :  { %1017 = vmatprep.subr.bf16.mxu0 %v1835_v10  ;;  %1058 = vmatprep.subr.bf16.mxu1 %v1837_v11 }
 0x451   :  { %1018 = vmatpush1.bf16.msra.mxu0 %v1839_v12  ;;  %1059 = vmatpush1.bf16.msra.mxu1 %v1841_v13 }
 0x452   :  { %1019 = vmatprep.subr.bf16.mxu0 %v1845_v14  ;;  %1060 = vmatprep.subr.bf16.mxu1 %v1849_v15 }
 0x455   :  { %1020 = vmatpush1.bf16.msra.mxu0 %v1851_v16  ;;  %1061 = vmatpush1.bf16.msra.mxu1 %v1855_v17 }
 0x456   :  { %1021 = vmatprep.subr.bf16.mxu0 %v1857_v18  ;;  %1062 = vmatprep.subr.bf16.mxu1 %v1861_v19 }
 0x459   :  { %1022 = vmatpush1.bf16.msra.mxu0 %v1863_v20  ;;  %1063 = vmatpush1.bf16.msra.mxu1 %v1865_v21 }
 0x45a   :  { %1023 = vmatprep.subr.bf16.mxu0 %v1869_v22  ;;  %1064 = vmatprep.subr.bf16.mxu1 %v1873_v23 }
 0x45d   :  { %1024 = vmatpush1.bf16.msra.mxu0 %v1877_v24  ;;  %1065 = vmatpush1.bf16.msra.mxu1 %v1879_v25 }
 0x45e   :  { %1025 = vmatprep.subr.bf16.mxu0 %v1883_v26  ;;  %1066 = vmatprep.subr.bf16.mxu1 %v1885_v27 }
 0x461   :  { %1026 = vmatpush1.bf16.msra.mxu0 %v1892_v29  ;;  %1067 = vmatpush1.bf16.msra.mxu1 %v1894_v30 }
 0x462   :  { %1027 = vmatprep.subr.bf16.mxu0 %v1898_v31  ;;  %1068 = vmatprep.subr.bf16.mxu1 %v1900_v32 }
 0x465   :  { %1028 = vmatpush1.bf16.msra.mxu0 %v1904_v33  ;;  %1069 = vmatpush1.bf16.msra.mxu1 %v1906_v34 }
 0x466   :  { %1154 = vmatprep.subr.bf16.mxu0 %v1813_v2  ;;  %1195 = vmatprep.subr.bf16.mxu1 %v1815_v3  ;;  %v870_v2 = vld [vmem:[#allocation2 + $0x4] ss:$8 sm:$0xf] }
 0x508   :  { %v906_v28 = vpop.f32.mrf.mxu0  ;;  %v947_v53 = vpop.f32.mrf.mxu1 }
 0x50a   :  { %v908_v54 = vpop.f32.mrf.mxu0  ;;  %v949_v55 = vpop.f32.mrf.mxu1 }
 0x50b   :  { %v958_v56 = vcombine.low %v906_v28, %v908_v54  ;;  %v959_v57 = vcombine.low %v947_v53, %v949_v55 }
 0x50c   :  { %v910_v58 = vpop.f32.mrf.mxu0  ;;  %v951_v59 = vpop.f32.mrf.mxu1 }
 0x50d   :  { %v966_v60 = vrot.slane %v958_v56, %v1957_v36  ;;  %v973_v61 = vrot.slane %v959_v57, %v1957_v36 }
 0x50e   :  { %v911_v62 = vpop.f32.mrf.mxu0  ;;  %v952_v63 = vpop.f32.mrf.mxu1 }
 0x50f   :  { %v974_v0 = vcombine.low %v966_v60, %v973_v61  ;;  %v1669_v60 = vld [vmem:[#allocation4 + $0xe0] ss:$16 sps:$4 sm:$0xff]   ;;  %v1670_v61 = vld [vmem:[#allocation4 + $0xe8] ss:$16 sps:$4 sm:$0xff]   ;;  %v1671_v62 = vld [vmem:[#allocation4 + $0xc4] ss:$16 sps:$4 sm:$0xff]  }
 0x510   :  { %v1672_v63 = vld [vmem:[#allocation4 + $0xcc] ss:$16 sps:$4 sm:$0xff]  }
 0x511   :  { %v981_v35 = vrot.slane %v974_v0, %v1957_v36  ;;  %v1673_v0 = vld [vmem:[#allocation4 + $0xc0] ss:$16 sps:$4 sm:$0xff]  }
 0x513   :  { %v983_v37 = vadd.f32 %v981_v35, %v870_v2  ;;  %v1674_v35 = vld [vmem:[#allocation4 + $0xc8] ss:$16 sps:$4 sm:$0xff]   ;;  %v1675_v2 = vld [vmem:[#allocation4 + $0xa4] ss:$16 sps:$4 sm:$0xff]  }
 0x515   :  { %v1508_v3 = vmul.f32 -1.442695, %v983_v37  ;;  %v1000_v39 = vrot.slane %v983_v37, 2  ;;  %v991_v44 = vrot.slane %v983_v37, 3  ;;  %v1676_v37 = vld [vmem:[#allocation4 + $0xac] ss:$16 sps:$4 sm:$0xff]  }
 0x517   :  { %1619 = vpow2.f32 %v1508_v3  ;;  %v1509_v40 = vmul.f32 -1.442695, %v1000_v39  ;;  %v1677_v3 = vld [vmem:[#allocation4 + $0xa0] ss:$16 sps:$4 sm:$0xff]   ;;  %v1678_v39 = vld [vmem:[#allocation4 + $0xa8] ss:$16 sps:$4 sm:$0xff]  }
 0x519   :  { %1621 = vpow2.f32 %v1509_v40  ;;  %v1679_v40 = vld [vmem:[#allocation4 + $0x84] ss:$16 sps:$4 sm:$0xff]  }
 0x524   :  { %v1620_v42 = vpop.eup %1619 }
 0x525   :  { %v987_v43 = vadd.f32 1.0, %v1620_v42  ;;  %v1680_v42 = vld [vmem:[#allocation4 + $0x8c] ss:$16 sps:$4 sm:$0xff]  }
 0x526   :  { %v1622_v45 = vpop.eup %1621 }
 0x527   :  { %1623 = vrcp.f32 %v987_v43  ;;  %v1005_v49 = vadd.f32 1.0, %v1622_v45  ;;  %v1681_v43 = vld [vmem:[#allocation4 + $0x80] ss:$16 sps:$4 sm:$0xff]   ;;  %v1684_v45 = vld [vmem:[#allocation4 + $0x6c] ss:$16 sps:$4 sm:$0xff]  }
 0x528   :  { %1625 = vtanh.f32 %v991_v44  ;;  %v1682_v44 = vld [vmem:[#allocation4 + $0x88] ss:$16 sps:$4 sm:$0xff]  }
 0x529   :  { %1627 = vrcp.f32 %v1005_v49  ;;  %v1688_v49 = vld [vmem:[#allocation4 + $0x4c] ss:$16 sps:$4 sm:$0xff]  }
 0x534   :  { %v1624_v46 = vpop.eup %1623 }
 0x535   :  { %v995_v47 = vrot.slane %v1624_v46, 1  ;;  %v1626_v48 = vpop.eup %1625 }
 0x536   :  { %v998_v51 = vmul.f32 %v1626_v48, %v1624_v46  ;;  %v1628_v38 = vpop.eup %1627  ;;  %v1685_v46 = vld [vmem:[#allocation4 + $0x60] ss:$16 sps:$4 sm:$0xff]   ;;  %v1687_v48 = vld [vmem:[#allocation4 + $0x44] ss:$16 sps:$4 sm:$0xff]  }
 0x537   :  { %v997_v50 = vmul.f32 %v995_v47, %v2088_v41  ;;  %v1686_v47 = vld [vmem:[#allocation4 + $0x68] ss:$16 sps:$4 sm:$0xff]  }
 0x539   :  { %v2129_v52 = vadd.f32 %v998_v51, %v997_v50  ;;  %v1689_v50 = vld [vmem:[#allocation4 + $0x40] ss:$16 sps:$4 sm:$0xff]   ;;  %v1690_v51 = vld [vmem:[#allocation4 + $0x48] ss:$16 sps:$4 sm:$0xff]  }
 0x53b   :  { %1629 = vtanh.f32 %v2129_v52 }
 0x548   :  { %v1630_v28 = vpop.eup %1629 }
 0x549   :  { %v1009_v53 = vmul.f32 %v1630_v28, %v1628_v38  ;;  %v1692_v38 = vld [vmem:[#allocation4 + $0x2c] ss:$16 sps:$4 sm:$0xff]   ;;  %v1693_v28 = vld [vmem:[#allocation4 + $0x20] ss:$16 sps:$4 sm:$0xff]  }
 0x54b   :  { %v1012_v54 = vpack.c.bf16 %v1009_v53, %v1009_v53  ;;  %v1694_v53 = vld [vmem:[#allocation4 + $0x28] ss:$16 sps:$4 sm:$0xff]  }
 0x54d   :  { %1046 = vmatmul.mubr.bf16.vlgmr.msra.gmra.mxu0 %v1012_v54  ;;  %1087 = vmatmul.mubr.bf16.vlgmr.msra.gmra.mxu1 %v1012_v54  ;;  %v1695_v54 = vld [vmem:[#allocation4 + $0x4] ss:$16 sps:$4 sm:$0xff]  }
 0x54e   :  { %1155 = vmatpush1.bf16.msra.mxu0 %v1818_v4  ;;  %1196 = vmatpush1.bf16.msra.mxu1 %v1820_v5  ;;  %v1667_v4 = vld [vmem:[#allocation4 + $0xe4] ss:$16 sps:$4 sm:$0xff]   ;;  %v1668_v5 = vld [vmem:[#allocation4 + $0xec] ss:$16 sps:$4 sm:$0xff]  }
 0x54f   :  { %1156 = vmatprep.subr.bf16.mxu0 %v1823_v6  ;;  %1197 = vmatprep.subr.bf16.mxu1 %v1827_v7 }
 0x550   :  { %1186 = vmatprep.mubr.bf16.mxu0 %v1746_v1  ;;  %1227 = vmatprep.mubr.bf16.mxu1 %v1746_v1 }
 0x552   :  { %1157 = vmatpush1.bf16.msra.mxu0 %v1829_v8  ;;  %1198 = vmatpush1.bf16.msra.mxu1 %v1832_v9 }
 0x553   :  { %1158 = vmatprep.subr.bf16.mxu0 %v1835_v10  ;;  %1199 = vmatprep.subr.bf16.mxu1 %v1837_v11 }
 0x556   :  { %1159 = vmatpush1.bf16.msra.mxu0 %v1839_v12  ;;  %1200 = vmatpush1.bf16.msra.mxu1 %v1841_v13 }
 0x557   :  { %1160 = vmatprep.subr.bf16.mxu0 %v1845_v14  ;;  %1201 = vmatprep.subr.bf16.mxu1 %v1849_v15 }
 0x55a   :  { %1161 = vmatpush1.bf16.msra.mxu0 %v1851_v16  ;;  %1202 = vmatpush1.bf16.msra.mxu1 %v1855_v17 }
 0x55b   :  { %1162 = vmatprep.subr.bf16.mxu0 %v1857_v18  ;;  %1203 = vmatprep.subr.bf16.mxu1 %v1861_v19 }
 0x55e   :  { %1163 = vmatpush1.bf16.msra.mxu0 %v1863_v20  ;;  %1204 = vmatpush1.bf16.msra.mxu1 %v1865_v21  ;;  %v1011_v20 = vld [vmem:[#allocation2 + $0x5] ss:$8 sm:$0xf] }
 0x55f   :  { %1164 = vmatprep.subr.bf16.mxu0 %v1869_v22  ;;  %1205 = vmatprep.subr.bf16.mxu1 %v1873_v23 }
 0x562   :  { %1165 = vmatpush1.bf16.msra.mxu0 %v1877_v24  ;;  %1206 = vmatpush1.bf16.msra.mxu1 %v1879_v25 }
 0x563   :  { %1166 = vmatprep.subr.bf16.mxu0 %v1883_v26  ;;  %1207 = vmatprep.subr.bf16.mxu1 %v1885_v27 }
 0x566   :  { %1167 = vmatpush1.bf16.msra.mxu0 %v1892_v29  ;;  %1208 = vmatpush1.bf16.msra.mxu1 %v1894_v30 }
 0x567   :  { %1168 = vmatprep.subr.bf16.mxu0 %v1898_v31  ;;  %1209 = vmatprep.subr.bf16.mxu1 %v1900_v32 }
 0x56a   :  { %1169 = vmatpush1.bf16.msra.mxu0 %v1904_v33  ;;  %1210 = vmatpush1.bf16.msra.mxu1 %v1906_v34 }
 0x56b   :  { %1295 = vmatprep.subr.bf16.mxu0 %v1667_v4  ;;  %1336 = vmatprep.subr.bf16.mxu1 %v1668_v5  ;;  %v1696_v4 = vld [vmem:[#allocation4 + $0xc] ss:$16 sps:$4 sm:$0xff]   ;;  %v1697_v5 = vld [vmem:[#allocation4] ss:$16 sps:$4 sm:$0xff]  }
 0x60d   :  { %v1047_v6 = vpop.f32.mrf.mxu0  ;;  %v1088_v7 = vpop.f32.mrf.mxu1 }
 0x60f   :  { %v1049_v8 = vpop.f32.mrf.mxu0  ;;  %v1090_v9 = vpop.f32.mrf.mxu1 }
 0x610   :  { %v1099_v10 = vcombine.low %v1047_v6, %v1049_v8  ;;  %v1100_v11 = vcombine.low %v1088_v7, %v1090_v9  ;;  %v1698_v6 = vld [vmem:[#allocation4 + $0x8] ss:$16 sps:$4 sm:$0xff]  }
 0x611   :  { %v1051_v12 = vpop.f32.mrf.mxu0  ;;  %v1092_v13 = vpop.f32.mrf.mxu1 }
 0x612   :  { %v1107_v14 = vrot.slane %v1099_v10, %v1957_v36  ;;  %v1114_v15 = vrot.slane %v1100_v11, %v1957_v36 }
 0x613   :  { %v1052_v16 = vpop.f32.mrf.mxu0  ;;  %v1093_v17 = vpop.f32.mrf.mxu1 }
 0x614   :  { %v1115_v18 = vcombine.low %v1107_v14, %v1114_v15 }
 0x616   :  { %v1122_v19 = vrot.slane %v1115_v18, %v1957_v36 }
 0x618   :  { %v1124_v21 = vadd.f32 %v1122_v19, %v1011_v20 }
 0x61a   :  { %v1510_v22 = vmul.f32 -1.442695, %v1124_v21  ;;  %v1141_v23 = vrot.slane %v1124_v21, 2  ;;  %v1132_v27 = vrot.slane %v1124_v21, 3 }
 0x61b   :  { %v1152_v21 = vld [vmem:[#allocation2 + $0x6] ss:$8 sm:$0xf] }
 0x61c   :  { %1631 = vpow2.f32 %v1510_v22  ;;  %v1511_v24 = vmul.f32 -1.442695, %v1141_v23 }
 0x61e   :  { %1633 = vpow2.f32 %v1511_v24 }
 0x629   :  { %v1632_v25 = vpop.eup %1631 }
 0x62a   :  { %v1128_v26 = vadd.f32 1.0, %v1632_v25 }
 0x62b   :  { %v1634_v29 = vpop.eup %1633 }
 0x62c   :  { %1635 = vrcp.f32 %v1128_v26  ;;  %v1146_v33 = vadd.f32 1.0, %v1634_v29 }
 0x62d   :  { %1637 = vtanh.f32 %v1132_v27 }
 0x62e   :  { %1639 = vrcp.f32 %v1146_v33 }
 0x639   :  { %v1636_v30 = vpop.eup %1635 }
 0x63a   :  { %v1136_v31 = vrot.slane %v1636_v30, 1  ;;  %v1638_v32 = vpop.eup %1637 }
 0x63b   :  { %v1139_v41 = vmul.f32 %v1638_v32, %v1636_v30  ;;  %v1640_v56 = vpop.eup %1639 }
 0x63c   :  { %v1138_v34 = vmul.f32 %v1136_v31, %v2129_v52  ;;  %v1691_v52 = vld [vmem:[#allocation4 + $0x24] ss:$16 sps:$4 sm:$0xff]  }
 0x63e   :  { %v2168_v55 = vadd.f32 %v1139_v41, %v1138_v34 }
 0x640   :  { %1641 = vtanh.f32 %v2168_v55 }
 0x64d   :  { %v1642_v57 = vpop.eup %1641 }
 0x64e   :  { %v1150_v58 = vmul.f32 %v1642_v57, %v1640_v56 }
 0x650   :  { %v1153_v59 = vpack.c.bf16 %v1150_v58, %v1150_v58 }
 0x652   :  { %1187 = vmatmul.mubr.bf16.vlgmr.msra.gmra.mxu0 %v1153_v59  ;;  %1228 = vmatmul.mubr.bf16.vlgmr.msra.gmra.mxu1 %v1153_v59 }
 0x653   :  { %1296 = vmatpush1.bf16.msra.mxu0 %v1669_v60  ;;  %1337 = vmatpush1.bf16.msra.mxu1 %v1670_v61 }
 0x654   :  { %1297 = vmatprep.subr.bf16.mxu0 %v1671_v62  ;;  %1338 = vmatprep.subr.bf16.mxu1 %v1672_v63 }
 0x655   :  { %1327 = vmatprep.mubr.bf16.mxu0 %v1746_v1  ;;  %1368 = vmatprep.mubr.bf16.mxu1 %v1746_v1  ;;  %v1683_v1 = vld [vmem:[#allocation4 + $0x64] ss:$16 sps:$4 sm:$0xff]  }
 0x657   :  { %1298 = vmatpush1.bf16.msra.mxu0 %v1673_v0  ;;  %1339 = vmatpush1.bf16.msra.mxu1 %v1674_v35 }
 0x658   :  { %1299 = vmatprep.subr.bf16.mxu0 %v1675_v2  ;;  %1340 = vmatprep.subr.bf16.mxu1 %v1676_v37 }
 0x65b   :  { %1300 = vmatpush1.bf16.msra.mxu0 %v1677_v3  ;;  %1341 = vmatpush1.bf16.msra.mxu1 %v1678_v39 }
 0x65c   :  { %1301 = vmatprep.subr.bf16.mxu0 %v1679_v40  ;;  %1342 = vmatprep.subr.bf16.mxu1 %v1680_v42 }
 0x65f   :  { %1302 = vmatpush1.bf16.msra.mxu0 %v1681_v43  ;;  %1343 = vmatpush1.bf16.msra.mxu1 %v1682_v44 }
 0x660   :  { %1303 = vmatprep.subr.bf16.mxu0 %v1683_v1  ;;  %1344 = vmatprep.subr.bf16.mxu1 %v1684_v45  ;;  %v1293_v45 = vld [vmem:[#allocation2 + $0x7] ss:$8 sm:$0xf] }
 0x663   :  { %1304 = vmatpush1.bf16.msra.mxu0 %v1685_v46  ;;  %1345 = vmatpush1.bf16.msra.mxu1 %v1686_v47 }
 0x664   :  { %1305 = vmatprep.subr.bf16.mxu0 %v1687_v48  ;;  %1346 = vmatprep.subr.bf16.mxu1 %v1688_v49 }
 0x667   :  { %1306 = vmatpush1.bf16.msra.mxu0 %v1689_v50  ;;  %1347 = vmatpush1.bf16.msra.mxu1 %v1690_v51 }
 0x668   :  { %1307 = vmatprep.subr.bf16.mxu0 %v1691_v52  ;;  %1348 = vmatprep.subr.bf16.mxu1 %v1692_v38 }
 0x66b   :  { %1308 = vmatpush1.bf16.msra.mxu0 %v1693_v28  ;;  %1349 = vmatpush1.bf16.msra.mxu1 %v1694_v53 }
 0x66c   :  { %1309 = vmatprep.subr.bf16.mxu0 %v1695_v54  ;;  %1350 = vmatprep.subr.bf16.mxu1 %v1696_v4 }
 0x66f   :  { %1310 = vmatpush1.bf16.msra.mxu0 %v1697_v5  ;;  %1351 = vmatpush1.bf16.msra.mxu1 %v1698_v6 }
 0x712   :  { %v1188_v7 = vpop.f32.mrf.mxu0  ;;  %v1229_v8 = vpop.f32.mrf.mxu1 }
 0x714   :  { %v1190_v9 = vpop.f32.mrf.mxu0  ;;  %v1231_v10 = vpop.f32.mrf.mxu1 }
 0x715   :  { %v1240_v11 = vcombine.low %v1188_v7, %v1190_v9  ;;  %v1241_v12 = vcombine.low %v1229_v8, %v1231_v10  ;;  %v1435_v9 = vld [vmem:[%s2196_s4] sm:$0x1]  ;;  %s1723_s4 = scalar_lea.vmem %s1452_s12, 32 }
 0x716   :  { %v1192_v13 = vpop.f32.mrf.mxu0  ;;  %v1233_v14 = vpop.f32.mrf.mxu1 }
 0x717   :  { %v1248_v15 = vrot.slane %v1240_v11, %v1957_v36  ;;  %v1255_v16 = vrot.slane %v1241_v12, %v1957_v36  ;;  %v1441_v13 = vld [vmem:[#allocation3] sm:$0x1] }
 0x718   :  { %v1193_v17 = vpop.f32.mrf.mxu0  ;;  %v1234_v18 = vpop.f32.mrf.mxu1 }
 0x719   :  { %v1256_v19 = vcombine.low %v1248_v15, %v1255_v16 }
 0x71b   :  { %v1263_v20 = vrot.slane %v1256_v19, %v1957_v36 }
 0x71d   :  { %v1265_v22 = vadd.f32 %v1263_v20, %v1152_v21 }
 0x71f   :  { %v1512_v23 = vmul.f32 -1.442695, %v1265_v22  ;;  %v1282_v24 = vrot.slane %v1265_v22, 2  ;;  %v1273_v29 = vrot.slane %v1265_v22, 3 }
 0x721   :  { %1643 = vpow2.f32 %v1512_v23  ;;  %v1513_v25 = vmul.f32 -1.442695, %v1282_v24 }
 0x723   :  { %1645 = vpow2.f32 %v1513_v25 }
 0x72e   :  { %v1644_v26 = vpop.eup %1643 }
 0x72f   :  { %v1269_v27 = vadd.f32 1.0, %v1644_v26 }
 0x730   :  { %v1646_v30 = vpop.eup %1645 }
 0x731   :  { %1647 = vrcp.f32 %v1269_v27  ;;  %v1287_v34 = vadd.f32 1.0, %v1646_v30 }
 0x732   :  { %1649 = vtanh.f32 %v1273_v29 }
 0x733   :  { %1651 = vrcp.f32 %v1287_v34 }
 0x73e   :  { %v1648_v31 = vpop.eup %1647 }
 0x73f   :  { %v1277_v32 = vrot.slane %v1648_v31, 1  ;;  %v1650_v33 = vpop.eup %1649 }
 0x740   :  { %v1280_v56 = vmul.f32 %v1650_v33, %v1648_v31  ;;  %v1652_v58 = vpop.eup %1651 }
 0x741   :  { %v1279_v41 = vmul.f32 %v1277_v32, %v2168_v55 }
 0x743   :  { %v1281_v57 = vadd.f32 %v1280_v56, %v1279_v41 }
 0x745   :  { %1653 = vtanh.f32 %v1281_v57 }
 0x752   :  { %v1654_v59 = vpop.eup %1653 }
 0x753   :  { %v1291_v60 = vmul.f32 %v1654_v59, %v1652_v58 }
 0x755   :  { %v1294_v61 = vpack.c.bf16 %v1291_v60, %v1291_v60 }
 0x757   :  { %1328 = vmatmul.mubr.bf16.vlgmr.msra.gmra.mxu0 %v1294_v61  ;;  %1369 = vmatmul.mubr.bf16.vlgmr.msra.gmra.mxu1 %v1294_v61 }
 0x817   :  { %v1329_v62 = vpop.f32.mrf.mxu0  ;;  %v1370_v63 = vpop.f32.mrf.mxu1 }
 0x819   :  { %v1331_v0 = vpop.f32.mrf.mxu0  ;;  %v1372_v35 = vpop.f32.mrf.mxu1 }
 0x81a   :  { %v1381_v2 = vcombine.low %v1329_v62, %v1331_v0  ;;  %v1382_v37 = vcombine.low %v1370_v63, %v1372_v35 }
 0x81b   :  { %v1333_v3 = vpop.f32.mrf.mxu0  ;;  %v1374_v39 = vpop.f32.mrf.mxu1 }
 0x81c   :  { %v1389_v55 = vrot.slane %v1381_v2, %v1957_v36  ;;  %v1396_v40 = vrot.slane %v1382_v37, %v1957_v36 }
 0x81d   :  { %v1334_v42 = vpop.f32.mrf.mxu0  ;;  %v1375_v43 = vpop.f32.mrf.mxu1 }
 0x81e   :  { %v1397_v44 = vcombine.low %v1389_v55, %v1396_v40 }
 0x820   :  { %v1404_v1 = vrot.slane %v1397_v44, %v1957_v36 }
 0x822   :  { %v1406_v46 = vadd.f32 %v1404_v1, %v1293_v45 }
 0x824   :  { %v1514_v47 = vmul.f32 -1.442695, %v1406_v46  ;;  %v1423_v48 = vrot.slane %v1406_v46, 2  ;;  %v1414_v52 = vrot.slane %v1406_v46, 3 }
 0x826   :  { %1655 = vpow2.f32 %v1514_v47  ;;  %v1515_v49 = vmul.f32 -1.442695, %v1423_v48 }
 0x828   :  { %1657 = vpow2.f32 %v1515_v49 }
 0x833   :  { %v1656_v50 = vpop.eup %1655 }
 0x834   :  { %v1410_v51 = vadd.f32 1.0, %v1656_v50 }
 0x835   :  { %v1658_v38 = vpop.eup %1657 }
 0x836   :  { %1659 = vrcp.f32 %v1410_v51  ;;  %v1428_v4 = vadd.f32 1.0, %v1658_v38 }
 0x837   :  { %1661 = vtanh.f32 %v1414_v52 }
 0x838   :  { %1663 = vrcp.f32 %v1428_v4 }
 0x843   :  { %v1660_v28 = vpop.eup %1659 }
 0x844   :  { %v1418_v53 = vrot.slane %v1660_v28, 1  ;;  %v1662_v54 = vpop.eup %1661 }
 0x845   :  { %v1421_v6 = vmul.f32 %v1662_v54, %v1660_v28  ;;  %v1664_v7 = vpop.eup %1663 }
 0x846   :  { %v1420_v5 = vmul.f32 %v1418_v53, %v1281_v57 }
 0x848   :  { %v1422_v36 = vadd.f32 %v1421_v6, %v1420_v5 }
 0x84a   :  { %1665 = vtanh.f32 %v1422_v36  ;;  %1434 = vst [vmem:[%s2202_s10] sm:$0x1] %v1422_v36  ;;  %s1719_s10 = scalar_lea.vmem %s1452_s12, 16 }
 0x84b   :  { %p1720_p5 = scmp.ne.s32.totalorder %s1452_s12, %s1719_s10  ;;  %p1725_p7 = scmp.lt.s32.totalorder %s1723_s4, %s1719_s10 }
 0x84d   :  { %p1726_p8 = por %p1725_p7, %p1724_p6 }
 0x84f   :  { %p1727_p9 = pnand %p1726_p8, %p1720_p5 }
 0x857   :  { %v1666_v8 = vpop.eup %1665 }
 0x858   :  { %v1432_v10 = vmul.f32 %v1666_v8, %v1664_v7 }
 0x85a   :  { %v1436_v11 = vmul.f32 %v1435_v9, %v1432_v10  ;;  %1433 = vst [vmem:[%s2201_s9] sm:$0x1] %v1432_v10 }
 0x85c   :  { %v1438_v12 = vsel %vm1437_vm0, %v1436_v11, 0.0 }
 0x85d   :  { %1439 = vadd.xlane.f32.xlu0 %v1438_v12 }
 0x8e6   :  { %v1440_v14 = vpop.xlane.xlu0 %1439 }
 0x8e7   :  { %v1442_v15 = vadd.f32 %v1441_v13, %v1440_v14 }
 0x8e9   :  { %1444 = vst.msk [vmem:[#allocation7] sm:$0x1] %vm1443_vm1, %v1442_v15 }
 0x8ea   :  { %1730 = shalt.err (!%p1727_p9)
}
 0x8eb   :  { %1454 = dma.vmem_to_hbm [thread:$0]  %s1452_s12, 16, %s2200_s8, [#allocation6]  }
 0x8ec   :  { %1741 = dma.done.wait [#allocation6], 16  }
 0x8ed   :  { %1742 = vsyncadd [#allocation6], 4294967280 }
 0x8ee   :  { %1466 = vsyncpa [#allocation5], 1 }
 0x8ef   :  { %1467 = vsyncpa [#allocation6], 1 }

</bundles_post_ra>
